<compile_context>
chip_gen: v6e
topology: v6e:2x2x1
jax: 0.10.0
libtpu: 0.0.40
codegen_flags: <defaults>
</compile_context>

<pallas_src>
import functools

import jax
import jax.numpy as jnp
from jax.experimental import pallas as pl
from jax.experimental.pallas import tpu as pltpu


# --------------------------------------------------------------------------
# Pallas kernels
# --------------------------------------------------------------------------
def encoder_stack_kernel(x_ref, mask_ref,
                         wqkv_ref, bqkv_ref, wo_ref, bo_ref,
                         g1_ref, be1_ref, w1_ref, b1_ref, w2_ref, b2_ref,
                         g2_ref, be2_ref,
                         o_ref, x_sc, *, num_heads):
    """Full transformer encoder stack for one batch element.

    grid = (batch, layer); the residual stream lives in x_sc (VMEM) across the
    layer axis. Weights are per-layer blocks selected by the layer grid index.
    """
    layer = pl.program_id(1)

    @pl.when(layer == 0)
    def _():
        x_sc[...] = x_ref[0]                      # load embedding once per batch

    x = x_sc[...]                                 # (L, H) f32 residual stream
    mask_add = mask_ref[...]                      # (1, 1, L): 0 attend / -1e9 pad

    L, H = x.shape
    nh = num_heads
    dh = H // nh
    scale = 1.0 / (dh ** 0.5)

    def layernorm(v, g_ref, b_ref):
        mu = jnp.mean(v, axis=-1, keepdims=True)
        var = jnp.mean((v - mu) ** 2, axis=-1, keepdims=True)
        return (v - mu) * jax.lax.rsqrt(var + 1e-6) * g_ref[0] + b_ref[0]

    # ---- multi-head self-attention (pre-LN), fused QKV, all heads batched ----
    h1 = layernorm(x, g1_ref, be1_ref)
    qkv = jnp.dot(h1.astype(jnp.bfloat16), wqkv_ref[0],
                  preferred_element_type=jnp.float32) + bqkv_ref[0]   # (L, 3H)

    def split_heads(t):  # (L, H) -> (nh, L, dh)
        return jnp.concatenate(
            [t[None, :, i * dh:(i + 1) * dh] for i in range(nh)], axis=0)

    q3 = split_heads(qkv[:, 0:H]).astype(jnp.bfloat16)
    k3 = split_heads(qkv[:, H:2 * H]).astype(jnp.bfloat16)
    v3 = split_heads(qkv[:, 2 * H:3 * H]).astype(jnp.bfloat16)

    s = jnp.einsum('hqd,hkd->hqk', q3, k3,
                   preferred_element_type=jnp.float32) * scale        # (nh, L, L)
    s = s + mask_add                                                  # broadcast
    m = jnp.max(s, axis=-1, keepdims=True)
    p = jnp.exp(s - m)
    p = p * pl.reciprocal(jnp.sum(p, axis=-1, keepdims=True), approx=True)
    ctx3 = jnp.einsum('hqk,hkd->hqd', p.astype(jnp.bfloat16), v3,
                      preferred_element_type=jnp.float32)             # (nh, L, dh)
    ctx = jnp.concatenate([ctx3[i] for i in range(nh)], axis=-1)      # (L, H)
    attn = jnp.dot(ctx.astype(jnp.bfloat16), wo_ref[0],
                   preferred_element_type=jnp.float32) + bo_ref[0]
    x = x + attn

    # ---- feed-forward (pre-LN) ----
    # TODO(synk): at large H, block the 4H FFN dimension over a grid axis instead
    # of holding w1/w2 whole (v7x 64 MiB VMEM budget).
    h2 = layernorm(x, g2_ref, be2_ref)
    f = jnp.dot(h2.astype(jnp.bfloat16), w1_ref[0],
                preferred_element_type=jnp.float32) + b1_ref[0]
    f = jax.nn.gelu(f)
    f = jnp.dot(f.astype(jnp.bfloat16), w2_ref[0],
                preferred_element_type=jnp.float32) + b2_ref[0]
    x = x + f

    x_sc[...] = x

    @pl.when(layer == pl.num_programs(1) - 1)
    def _():
        o_ref[0] = x


def conv_pool_kernel(x_ref, *args, kernel_sizes):
    """All conv_and_pool branches fused: per batch element, for every kernel size
    compute ReLU(conv) + max over time via one im2col matmul, then write one
    lane-dense (1, sum(filter_num)) row."""
    o_ref = args[-1]
    wb = args[:-1]                               # (w_k, b_k) interleaved
    x = x_ref[0]                                 # (L, H) f32
    L = x.shape[0]
    outs = []
    for i, ks in enumerate(kernel_sizes):
        w_ref = wb[2 * i]                        # (ks*H, F) bf16
        b_ref = wb[2 * i + 1]                    # (1, F)    f32
        t_out = L - ks + 1
        # im2col over the (small, static) tap dimension -> single K = ks*H matmul
        win = jnp.concatenate([x[j:j + t_out, :] for j in range(ks)], axis=-1)
        acc = jnp.dot(win.astype(jnp.bfloat16), w_ref[...],
                      preferred_element_type=jnp.float32) + b_ref[...]
        acc = jnp.maximum(acc, 0.0)                       # ReLU(conv + bias)
        outs.append(jnp.max(acc, axis=0, keepdims=True))  # max-pool over time
    o_ref[...] = jnp.concatenate(outs, axis=-1)           # (1, F_total)


# --------------------------------------------------------------------------
# Wrappers around pallas_call
# --------------------------------------------------------------------------
_STACK_WEIGHT_NAMES = ["wqkv", "bqkv", "wo", "bo", "g1", "be1",
                       "w1", "b1", "w2", "b2", "g2", "be2"]


def run_encoder_stack(x, mask_add, params, num_heads):
    B, L, H = x.shape
    n_layers = params["wqkv"].shape[0]

    def xmap(b, l):
        return (b, 0, 0)

    def lmap(b, l):
        return (l, 0, 0)

    weights = [params[n] for n in _STACK_WEIGHT_NAMES]
    w_specs = [pl.BlockSpec((1,) + w.shape[1:], lmap) for w in weights]

    in_specs = ([pl.BlockSpec((1, L, H), xmap),        # embeddings
                 pl.BlockSpec((1, 1, L), xmap)]        # additive key mask
                + w_specs)

    return pl.pallas_call(
        functools.partial(encoder_stack_kernel, num_heads=num_heads),
        out_shape=jax.ShapeDtypeStruct((B, L, H), jnp.float32),
        grid=(B, n_layers),
        in_specs=in_specs,
        out_specs=pl.BlockSpec((1, L, H), xmap),
        scratch_shapes=[pltpu.VMEM((L, H), jnp.float32)],
        compiler_params=pltpu.CompilerParams(
            dimension_semantics=("parallel", "arbitrary"),
            vmem_limit_bytes=32 * 1024 * 1024),
    )(x, mask_add, *weights)


def run_conv_pool(x, conv_ws, conv_bs, kernel_sizes):
    B, L, H = x.shape
    f_total = sum(int(w.shape[-1]) for w in conv_ws)

    wb = []
    for w, b in zip(conv_ws, conv_bs):
        wb += [w, b]

    in_specs = [pl.BlockSpec((1, L, H), lambda b: (b, 0, 0))]
    for arr in wb:
        in_specs.append(pl.BlockSpec(arr.shape, lambda b, _n=arr.ndim: (0,) * _n))

    return pl.pallas_call(
        functools.partial(conv_pool_kernel, kernel_sizes=tuple(kernel_sizes)),
        out_shape=jax.ShapeDtypeStruct((B, f_total), jnp.float32),
        grid=(B,),
        in_specs=in_specs,
        out_specs=pl.BlockSpec((1, f_total), lambda b: (b, 0)),
        compiler_params=pltpu.CompilerParams(
            dimension_semantics=("parallel",),
            vmem_limit_bytes=32 * 1024 * 1024),
    )(x, *wb)


# --------------------------------------------------------------------------
# Parameter init (deterministic, synthetic) + full forward
# --------------------------------------------------------------------------
def init_params(key, *, type_vocab, value_vocab, H, max_len, n_layers,
                attn_heads, kernel_sizes):
    filter_num = H // len(kernel_sizes)
    ff = 4 * H
    wdt = jnp.bfloat16   # matmul weights stored in bf16 (f32 accumulation in-kernel)

    def nrm(k, shape, scale=0.02, dtype=jnp.float32):
        return (scale * jax.random.normal(k, shape)).astype(dtype)

    keys = jax.random.split(key, 7 + len(kernel_sizes))
    params = {
        "type_emb": nrm(keys[0], (type_vocab, H)),
        "value_emb": nrm(keys[1], (value_vocab, H)),
        "pos_emb": nrm(keys[2], (max_len, H)),
        "attn_heads": attn_heads,
        "kernel_sizes": list(kernel_sizes),
        # transformer stack, layer-stacked along the leading axis
        "wqkv": nrm(keys[3], (n_layers, H, 3 * H), dtype=wdt),   # wq|wk|wv fused
        "bqkv": jnp.zeros((n_layers, 1, 3 * H), jnp.float32),
        "wo": nrm(keys[4], (n_layers, H, H), dtype=wdt),
        "bo": jnp.zeros((n_layers, 1, H), jnp.float32),
        "g1": jnp.ones((n_layers, 1, H), jnp.float32),
        "be1": jnp.zeros((n_layers, 1, H), jnp.float32),
        "w1": nrm(keys[5], (n_layers, H, ff), dtype=wdt),
        "b1": jnp.zeros((n_layers, 1, ff), jnp.float32),
        "w2": nrm(keys[6], (n_layers, ff, H), dtype=wdt),
        "b2": jnp.zeros((n_layers, 1, H), jnp.float32),
        "g2": jnp.ones((n_layers, 1, H), jnp.float32),
        "be2": jnp.zeros((n_layers, 1, H), jnp.float32),
        "conv_w": [],
        "conv_b": [],
    }
    for ci, ks in enumerate(kernel_sizes):
        ck = keys[7 + ci]
        # torch layout (F, 1, k, H) stored pre-flattened as (k*H, F) for im2col matmul
        params["conv_w"].append(nrm(ck, (ks * H, filter_num), scale=0.1, dtype=wdt))
        params["conv_b"].append(jnp.zeros((1, filter_num), jnp.float32))
    return params


def encoder_forward(params, type_seq, value_seq, mask=None):
    B, L = value_seq.shape
    if mask is None:
        key_mask = value_seq > 0                                         # (B, L)
        mask_out = jnp.broadcast_to(key_mask[:, None, None, :], (B, 1, L, L))
    else:
        mask_out = mask
        # TODO(synk): fused kernel supports key-padding style masks only; a general
        # (B,1,L,L) mask is reduced to its per-key row here.
        key_mask = mask[:, 0, 0, :] > 0
    # additive mask: 0 where attend, -1e9 where padded  -> (B, 1, L)
    mask_add = jnp.where(key_mask, 0.0, -1e9).astype(jnp.float32)[:, None, :]

    # SolEmbedding: type + value + positional embedding sum (gather is host-side glue).
    # TODO(synk): dropout omitted (inference mode).
    x = (params["type_emb"][type_seq]
         + params["value_emb"][value_seq]
         + params["pos_emb"][None, :L, :]).astype(jnp.float32)

    # full transformer stack: ONE pallas_call, grid = (batch, layer)
    local_resp = run_encoder_stack(x, mask_add, params, params["attn_heads"])

    # all conv_and_pool branches: ONE pallas_call, lane-dense (B, H) output
    global_resp = run_conv_pool(local_resp, params["conv_w"], params["conv_b"],
                                params["kernel_sizes"])
    return local_resp, global_resp, mask_out


# --------------------------------------------------------------------------
if __name__ == "__main__":
    B, L, H = 2, 16, 32
    n_layers, attn_heads = 2, 4
    type_vocab, value_vocab = 20, 30
    kernel_sizes = (3, 5, 7, 9)

    key = jax.random.PRNGKey(0)
    kp, kt, kv = jax.random.split(key, 3)
    params = init_params(kp, type_vocab=type_vocab, value_vocab=value_vocab,
                         H=H, max_len=L, n_layers=n_layers,
                         attn_heads=attn_heads, kernel_sizes=kernel_sizes)

    type_seq = jax.random.randint(kt, (B, L), 0, type_vocab, dtype=jnp.int32)
    value_seq = jax.random.randint(kv, (B, L), 0, value_vocab, dtype=jnp.int32)

    local_resp, global_resp, mask = encoder_forward(params, type_seq, value_seq, None)
    jax.block_until_ready((local_resp, global_resp, mask))

    assert local_resp.shape == (B, L, H)
    assert global_resp.shape == (B, H)          # 4 * filter_num == H
    assert mask.shape == (B, 1, L, L)
    assert jnp.isfinite(local_resp).all() and jnp.isfinite(global_resp).all()
    print("KERNEL_OK")
</pallas_src>

<mosaic_0001>
module attributes {stable_mosaic.version = 11 : i64} {
  func.func @encoder_stack_kernel(%arg0: i32, %arg1: i32, %arg2: memref<1x16x32xf32, #tpu.memory_space<vmem>>, %arg3: memref<1x1x16xf32, #tpu.memory_space<vmem>>, %arg4: memref<1x32x96xbf16, #tpu.memory_space<vmem>>, %arg5: memref<1x1x96xf32, #tpu.memory_space<vmem>>, %arg6: memref<1x32x32xbf16, #tpu.memory_space<vmem>>, %arg7: memref<1x1x32xf32, #tpu.memory_space<vmem>>, %arg8: memref<1x1x32xf32, #tpu.memory_space<vmem>>, %arg9: memref<1x1x32xf32, #tpu.memory_space<vmem>>, %arg10: memref<1x32x128xbf16, #tpu.memory_space<vmem>>, %arg11: memref<1x1x128xf32, #tpu.memory_space<vmem>>, %arg12: memref<1x128x32xbf16, #tpu.memory_space<vmem>>, %arg13: memref<1x1x32xf32, #tpu.memory_space<vmem>>, %arg14: memref<1x1x32xf32, #tpu.memory_space<vmem>>, %arg15: memref<1x1x32xf32, #tpu.memory_space<vmem>>, %arg16: memref<1x16x32xf32, #tpu.memory_space<vmem>>, %arg17: memref<16x32xf32, #tpu.memory_space<vmem>>) attributes {dimension_semantics = [#tpu.dimension_semantics<parallel>, #tpu.dimension_semantics<arbitrary>], iteration_bounds = array<i64: 2, 2>, scalar_prefetch = 0 : i64, scratch_operands = 1 : i64, tpu.core_type = #tpu.core_type<tc>, window_params = [{transform_indices = @transform_0, window_bounds = array<i64: 1, 16, 32>}, {transform_indices = @transform_1, window_bounds = array<i64: 1, 1, 16>}, {transform_indices = @transform_2, window_bounds = array<i64: 1, 32, 96>}, {transform_indices = @transform_3, window_bounds = array<i64: 1, 1, 96>}, {transform_indices = @transform_4, window_bounds = array<i64: 1, 32, 32>}, {transform_indices = @transform_5, window_bounds = array<i64: 1, 1, 32>}, {transform_indices = @transform_6, window_bounds = array<i64: 1, 1, 32>}, {transform_indices = @transform_7, window_bounds = array<i64: 1, 1, 32>}, {transform_indices = @transform_8, window_bounds = array<i64: 1, 32, 128>}, {transform_indices = @transform_9, window_bounds = array<i64: 1, 1, 128>}, {transform_indices = @transform_10, window_bounds = array<i64: 1, 128, 32>}, {transform_indices = @transform_11, window_bounds = array<i64: 1, 1, 32>}, {transform_indices = @transform_12, window_bounds = array<i64: 1, 1, 32>}, {transform_indices = @transform_13, window_bounds = array<i64: 1, 1, 32>}, {transform_indices = @transform_14, window_bounds = array<i64: 1, 16, 32>}]} {
    %c0_i32 = arith.constant 0 : i32
    %0 = arith.cmpi eq, %arg1, %c0_i32 : i32
    %1 = arith.extui %0 : i1 to i32
    %c0_i32_0 = arith.constant 0 : i32
    %2 = arith.cmpi ne, %1, %c0_i32_0 : i32
    scf.if %2 {
      %c0_66 = arith.constant 0 : index
      %c0_67 = arith.constant 0 : index
      %c0_68 = arith.constant 0 : index
      %167 = vector.load %arg2[%c0_66, %c0_67, %c0_68] : memref<1x16x32xf32, #tpu.memory_space<vmem>>, vector<1x16x32xf32>
      %168 = vector.shape_cast %167 : vector<1x16x32xf32> to vector<16x32xf32>
      %c0_69 = arith.constant 0 : index
      %c0_70 = arith.constant 0 : index
      %169 = vector.load %arg17[%c0_69, %c0_70] : memref<16x32xf32, #tpu.memory_space<vmem>>, vector<16x32xf32>
      tpu.vector_store %arg17[%c0_69, %c0_70], %168 {strides = array<i32>} : memref<16x32xf32, #tpu.memory_space<vmem>>, vector<16x32xf32>,
    } else {
    }
    %c0 = arith.constant 0 : index
    %c0_1 = arith.constant 0 : index
    %3 = vector.load %arg17[%c0, %c0_1] : memref<16x32xf32, #tpu.memory_space<vmem>>, vector<16x32xf32>
    %c0_2 = arith.constant 0 : index
    %c0_3 = arith.constant 0 : index
    %c0_4 = arith.constant 0 : index
    %4 = vector.load %arg3[%c0_2, %c0_3, %c0_4] : memref<1x1x16xf32, #tpu.memory_space<vmem>>, vector<1x1x16xf32>
    %cst = arith.constant dense<0.000000e+00> : vector<16xf32>
    %5 = vector.multi_reduction <add>, %3, %cst [1] : vector<16x32xf32> to vector<16xf32>
    %6 = vector.shape_cast %5 : vector<16xf32> to vector<16x1xf32>
    %cst_5 = arith.constant 3.200000e+01 : f32
    %7 = vector.broadcast %cst_5 : f32 to vector<16x1xf32>
    %8 = arith.divf %6, %7 : vector<16x1xf32>
    %9 = vector.broadcast %8 : vector<16x1xf32> to vector<16x32xf32>
    %10 = arith.subf %3, %9 : vector<16x32xf32>
    %11 = arith.mulf %10, %10 : vector<16x32xf32>
    %cst_6 = arith.constant dense<0.000000e+00> : vector<16xf32>
    %12 = vector.multi_reduction <add>, %11, %cst_6 [1] : vector<16x32xf32> to vector<16xf32>
    %13 = vector.shape_cast %12 : vector<16xf32> to vector<16x1xf32>
    %cst_7 = arith.constant 3.200000e+01 : f32
    %14 = vector.broadcast %cst_7 : f32 to vector<16x1xf32>
    %15 = arith.divf %13, %14 : vector<16x1xf32>
    %16 = vector.broadcast %8 : vector<16x1xf32> to vector<16x32xf32>
    %17 = arith.subf %3, %16 : vector<16x32xf32>
    %cst_8 = arith.constant 9.99999997E-7 : f32
    %18 = vector.broadcast %cst_8 : f32 to vector<16x1xf32>
    %19 = arith.addf %15, %18 : vector<16x1xf32>
    %20 = math.rsqrt %19 : vector<16x1xf32>
    %21 = vector.broadcast %20 : vector<16x1xf32> to vector<16x32xf32>
    %22 = arith.mulf %17, %21 : vector<16x32xf32>
    %c0_9 = arith.constant 0 : index
    %c0_10 = arith.constant 0 : index
    %c0_11 = arith.constant 0 : index
    %23 = vector.load %arg8[%c0_9, %c0_10, %c0_11] : memref<1x1x32xf32, #tpu.memory_space<vmem>>, vector<1x1x32xf32>
    %24 = vector.shape_cast %23 : vector<1x1x32xf32> to vector<1x32xf32>
    %25 = vector.broadcast %24 : vector<1x32xf32> to vector<16x32xf32>
    %26 = arith.mulf %22, %25 : vector<16x32xf32>
    %c0_12 = arith.constant 0 : index
    %c0_13 = arith.constant 0 : index
    %c0_14 = arith.constant 0 : index
    %27 = vector.load %arg9[%c0_12, %c0_13, %c0_14] : memref<1x1x32xf32, #tpu.memory_space<vmem>>, vector<1x1x32xf32>
    %28 = vector.shape_cast %27 : vector<1x1x32xf32> to vector<1x32xf32>
    %29 = vector.broadcast %28 : vector<1x32xf32> to vector<16x32xf32>
    %30 = arith.addf %26, %29 : vector<16x32xf32>
    %31 = arith.truncf %30 : vector<16x32xf32> to vector<16x32xbf16>
    %c0_15 = arith.constant 0 : index
    %c0_16 = arith.constant 0 : index
    %c0_17 = arith.constant 0 : index
    %32 = vector.load %arg4[%c0_15, %c0_16, %c0_17] : memref<1x32x96xbf16, #tpu.memory_space<vmem>>, vector<1x32x96xbf16>
    %33 = vector.shape_cast %32 : vector<1x32x96xbf16> to vector<32x96xbf16>
    %cst_18 = arith.constant dense<0.000000e+00> : vector<16x96xf32>
    %34 = tpu.matmul %31, %33, %cst_18 {dimension_numbers = #tpu.dot_dimension_numbers<[1], [0], [0], [1], [0, 0, 1, 1], [], []>} : vector<16x32xbf16>, vector<32x96xbf16>, vector<16x96xf32> -> vector<16x96xf32>
    %c0_19 = arith.constant 0 : index
    %c0_20 = arith.constant 0 : index
    %c0_21 = arith.constant 0 : index
    %35 = vector.load %arg5[%c0_19, %c0_20, %c0_21] : memref<1x1x96xf32, #tpu.memory_space<vmem>>, vector<1x1x96xf32>
    %36 = vector.shape_cast %35 : vector<1x1x96xf32> to vector<1x96xf32>
    %37 = vector.broadcast %36 : vector<1x96xf32> to vector<16x96xf32>
    %38 = arith.addf %34, %37 : vector<16x96xf32>
    %39 = vector.extract_strided_slice %38 {offsets = [0, 0], sizes = [16, 32], strides = [1, 1]} : vector<16x96xf32> to vector<16x32xf32>
    %40 = vector.extract_strided_slice %39 {offsets = [0, 0], sizes = [16, 8], strides = [1, 1]} : vector<16x32xf32> to vector<16x8xf32>
    %41 = vector.shape_cast %40 : vector<16x8xf32> to vector<1x16x8xf32>
    %42 = vector.extract_strided_slice %39 {offsets = [0, 8], sizes = [16, 8], strides = [1, 1]} : vector<16x32xf32> to vector<16x8xf32>
    %43 = vector.shape_cast %42 : vector<16x8xf32> to vector<1x16x8xf32>
    %44 = vector.extract_strided_slice %39 {offsets = [0, 16], sizes = [16, 8], strides = [1, 1]} : vector<16x32xf32> to vector<16x8xf32>
    %45 = vector.shape_cast %44 : vector<16x8xf32> to vector<1x16x8xf32>
    %46 = vector.extract_strided_slice %39 {offsets = [0, 24], sizes = [16, 8], strides = [1, 1]} : vector<16x32xf32> to vector<16x8xf32>
    %47 = vector.shape_cast %46 : vector<16x8xf32> to vector<1x16x8xf32>
    %48 = tpu.concatenate %41, %43, %45, %47 in 0 : vector<1x16x8xf32>, vector<1x16x8xf32>, vector<1x16x8xf32>, vector<1x16x8xf32> -> vector<4x16x8xf32>
    %49 = arith.truncf %48 : vector<4x16x8xf32> to vector<4x16x8xbf16>
    %50 = vector.extract_strided_slice %38 {offsets = [0, 32], sizes = [16, 32], strides = [1, 1]} : vector<16x96xf32> to vector<16x32xf32>
    %51 = vector.extract_strided_slice %50 {offsets = [0, 0], sizes = [16, 8], strides = [1, 1]} : vector<16x32xf32> to vector<16x8xf32>
    %52 = vector.shape_cast %51 : vector<16x8xf32> to vector<1x16x8xf32>
    %53 = vector.extract_strided_slice %50 {offsets = [0, 8], sizes = [16, 8], strides = [1, 1]} : vector<16x32xf32> to vector<16x8xf32>
    %54 = vector.shape_cast %53 : vector<16x8xf32> to vector<1x16x8xf32>
    %55 = vector.extract_strided_slice %50 {offsets = [0, 16], sizes = [16, 8], strides = [1, 1]} : vector<16x32xf32> to vector<16x8xf32>
    %56 = vector.shape_cast %55 : vector<16x8xf32> to vector<1x16x8xf32>
    %57 = vector.extract_strided_slice %50 {offsets = [0, 24], sizes = [16, 8], strides = [1, 1]} : vector<16x32xf32> to vector<16x8xf32>
    %58 = vector.shape_cast %57 : vector<16x8xf32> to vector<1x16x8xf32>
    %59 = tpu.concatenate %52, %54, %56, %58 in 0 : vector<1x16x8xf32>, vector<1x16x8xf32>, vector<1x16x8xf32>, vector<1x16x8xf32> -> vector<4x16x8xf32>
    %60 = arith.truncf %59 : vector<4x16x8xf32> to vector<4x16x8xbf16>
    %61 = vector.extract_strided_slice %38 {offsets = [0, 64], sizes = [16, 32], strides = [1, 1]} : vector<16x96xf32> to vector<16x32xf32>
    %62 = vector.extract_strided_slice %61 {offsets = [0, 0], sizes = [16, 8], strides = [1, 1]} : vector<16x32xf32> to vector<16x8xf32>
    %63 = vector.shape_cast %62 : vector<16x8xf32> to vector<1x16x8xf32>
    %64 = vector.extract_strided_slice %61 {offsets = [0, 8], sizes = [16, 8], strides = [1, 1]} : vector<16x32xf32> to vector<16x8xf32>
    %65 = vector.shape_cast %64 : vector<16x8xf32> to vector<1x16x8xf32>
    %66 = vector.extract_strided_slice %61 {offsets = [0, 16], sizes = [16, 8], strides = [1, 1]} : vector<16x32xf32> to vector<16x8xf32>
    %67 = vector.shape_cast %66 : vector<16x8xf32> to vector<1x16x8xf32>
    %68 = vector.extract_strided_slice %61 {offsets = [0, 24], sizes = [16, 8], strides = [1, 1]} : vector<16x32xf32> to vector<16x8xf32>
    %69 = vector.shape_cast %68 : vector<16x8xf32> to vector<1x16x8xf32>
    %70 = tpu.concatenate %63, %65, %67, %69 in 0 : vector<1x16x8xf32>, vector<1x16x8xf32>, vector<1x16x8xf32>, vector<1x16x8xf32> -> vector<4x16x8xf32>
    %71 = arith.truncf %70 : vector<4x16x8xf32> to vector<4x16x8xbf16>
    "tpu.trace_start"() <{level = 10 : i32, message = "hqd,hkd->hqk"}> : () -> ()
    %cst_22 = arith.constant dense<0.000000e+00> : vector<4x16x16xf32>
    %72 = tpu.matmul %49, %60, %cst_22 {dimension_numbers = #tpu.dot_dimension_numbers<[2], [2], [1], [1], [0, 0, 0, 1, 1, 1], [0], [0]>} : vector<4x16x8xbf16>, vector<4x16x8xbf16>, vector<4x16x16xf32> -> vector<4x16x16xf32>
    "tpu.trace_stop"() : () -> ()
    %cst_23 = arith.constant 0.353553385 : f32
    %73 = vector.broadcast %cst_23 : f32 to vector<4x16x16xf32>
    %74 = arith.mulf %72, %73 : vector<4x16x16xf32>
    %75 = vector.broadcast %4 : vector<1x1x16xf32> to vector<4x16x16xf32>
    %76 = arith.addf %74, %75 : vector<4x16x16xf32>
    %cst_24 = arith.constant dense<0xFF800000> : vector<4x16xf32>
    %77 = vector.multi_reduction <maximumf>, %76, %cst_24 [2] : vector<4x16x16xf32> to vector<4x16xf32>
    %78 = vector.shape_cast %77 : vector<4x16xf32> to vector<4x16x1xf32>
    %79 = vector.broadcast %78 : vector<4x16x1xf32> to vector<4x16x16xf32>
    %80 = arith.subf %76, %79 : vector<4x16x16xf32>
    %81 = math.exp %80 : vector<4x16x16xf32>
    %cst_25 = arith.constant dense<0.000000e+00> : vector<4x16xf32>
    %82 = vector.multi_reduction <add>, %81, %cst_25 [2] : vector<4x16x16xf32> to vector<4x16xf32>
    %83 = vector.shape_cast %82 : vector<4x16xf32> to vector<4x16x1xf32>
    %84 = tpu.reciprocal %83 {approx = true} : vector<4x16x1xf32> -> vector<4x16x1xf32>
    %85 = vector.broadcast %84 : vector<4x16x1xf32> to vector<4x16x16xf32>
    %86 = arith.mulf %81, %85 : vector<4x16x16xf32>
    %87 = arith.truncf %86 : vector<4x16x16xf32> to vector<4x16x16xbf16>
    "tpu.trace_start"() <{level = 10 : i32, message = "hqk,hkd->hqd"}> : () -> ()
    %cst_26 = arith.constant dense<0.000000e+00> : vector<4x16x8xf32>
    %88 = tpu.matmul %87, %71, %cst_26 {dimension_numbers = #tpu.dot_dimension_numbers<[2], [1], [1], [2], [0, 0, 0, 1, 1, 2], [0], [0]>} : vector<4x16x16xbf16>, vector<4x16x8xbf16>, vector<4x16x8xf32> -> vector<4x16x8xf32>
    "tpu.trace_stop"() : () -> ()
    %89 = vector.extract_strided_slice %88 {offsets = [0, 0, 0], sizes = [1, 16, 8], strides = [1, 1, 1]} : vector<4x16x8xf32> to vector<1x16x8xf32>
    %90 = vector.shape_cast %89 : vector<1x16x8xf32> to vector<16x8xf32>
    %91 = vector.extract_strided_slice %88 {offsets = [1, 0, 0], sizes = [1, 16, 8], strides = [1, 1, 1]} : vector<4x16x8xf32> to vector<1x16x8xf32>
    %92 = vector.shape_cast %91 : vector<1x16x8xf32> to vector<16x8xf32>
    %93 = vector.extract_strided_slice %88 {offsets = [2, 0, 0], sizes = [1, 16, 8], strides = [1, 1, 1]} : vector<4x16x8xf32> to vector<1x16x8xf32>
    %94 = vector.shape_cast %93 : vector<1x16x8xf32> to vector<16x8xf32>
    %95 = vector.extract_strided_slice %88 {offsets = [3, 0, 0], sizes = [1, 16, 8], strides = [1, 1, 1]} : vector<4x16x8xf32> to vector<1x16x8xf32>
    %96 = vector.shape_cast %95 : vector<1x16x8xf32> to vector<16x8xf32>
    %97 = tpu.concatenate %90, %92, %94, %96 in 1 : vector<16x8xf32>, vector<16x8xf32>, vector<16x8xf32>, vector<16x8xf32> -> vector<16x32xf32>
    %98 = arith.truncf %97 : vector<16x32xf32> to vector<16x32xbf16>
    %c0_27 = arith.constant 0 : index
    %c0_28 = arith.constant 0 : index
    %c0_29 = arith.constant 0 : index
    %99 = vector.load %arg6[%c0_27, %c0_28, %c0_29] : memref<1x32x32xbf16, #tpu.memory_space<vmem>>, vector<1x32x32xbf16>
    %100 = vector.shape_cast %99 : vector<1x32x32xbf16> to vector<32x32xbf16>
    %cst_30 = arith.constant dense<0.000000e+00> : vector<16x32xf32>
    %101 = tpu.matmul %98, %100, %cst_30 {dimension_numbers = #tpu.dot_dimension_numbers<[1], [0], [0], [1], [0, 0, 1, 1], [], []>} : vector<16x32xbf16>, vector<32x32xbf16>, vector<16x32xf32> -> vector<16x32xf32>
    %c0_31 = arith.constant 0 : index
    %c0_32 = arith.constant 0 : index
    %c0_33 = arith.constant 0 : index
    %102 = vector.load %arg7[%c0_31, %c0_32, %c0_33] : memref<1x1x32xf32, #tpu.memory_space<vmem>>, vector<1x1x32xf32>
    %103 = vector.shape_cast %102 : vector<1x1x32xf32> to vector<1x32xf32>
    %104 = vector.broadcast %103 : vector<1x32xf32> to vector<16x32xf32>
    %105 = arith.addf %101, %104 : vector<16x32xf32>
    %106 = arith.addf %3, %105 : vector<16x32xf32>
    %cst_34 = arith.constant dense<0.000000e+00> : vector<16xf32>
    %107 = vector.multi_reduction <add>, %106, %cst_34 [1] : vector<16x32xf32> to vector<16xf32>
    %108 = vector.shape_cast %107 : vector<16xf32> to vector<16x1xf32>
    %cst_35 = arith.constant 3.200000e+01 : f32
    %109 = vector.broadcast %cst_35 : f32 to vector<16x1xf32>
    %110 = arith.divf %108, %109 : vector<16x1xf32>
    %111 = vector.broadcast %110 : vector<16x1xf32> to vector<16x32xf32>
    %112 = arith.subf %106, %111 : vector<16x32xf32>
    %113 = arith.mulf %112, %112 : vector<16x32xf32>
    %cst_36 = arith.constant dense<0.000000e+00> : vector<16xf32>
    %114 = vector.multi_reduction <add>, %113, %cst_36 [1] : vector<16x32xf32> to vector<16xf32>
    %115 = vector.shape_cast %114 : vector<16xf32> to vector<16x1xf32>
    %cst_37 = arith.constant 3.200000e+01 : f32
    %116 = vector.broadcast %cst_37 : f32 to vector<16x1xf32>
    %117 = arith.divf %115, %116 : vector<16x1xf32>
    %118 = vector.broadcast %110 : vector<16x1xf32> to vector<16x32xf32>
    %119 = arith.subf %106, %118 : vector<16x32xf32>
    %cst_38 = arith.constant 9.99999997E-7 : f32
    %120 = vector.broadcast %cst_38 : f32 to vector<16x1xf32>
    %121 = arith.addf %117, %120 : vector<16x1xf32>
    %122 = math.rsqrt %121 : vector<16x1xf32>
    %123 = vector.broadcast %122 : vector<16x1xf32> to vector<16x32xf32>
    %124 = arith.mulf %119, %123 : vector<16x32xf32>
    %c0_39 = arith.constant 0 : index
    %c0_40 = arith.constant 0 : index
    %c0_41 = arith.constant 0 : index
    %125 = vector.load %arg14[%c0_39, %c0_40, %c0_41] : memref<1x1x32xf32, #tpu.memory_space<vmem>>, vector<1x1x32xf32>
    %126 = vector.shape_cast %125 : vector<1x1x32xf32> to vector<1x32xf32>
    %127 = vector.broadcast %126 : vector<1x32xf32> to vector<16x32xf32>
    %128 = arith.mulf %124, %127 : vector<16x32xf32>
    %c0_42 = arith.constant 0 : index
    %c0_43 = arith.constant 0 : index
    %c0_44 = arith.constant 0 : index
    %129 = vector.load %arg15[%c0_42, %c0_43, %c0_44] : memref<1x1x32xf32, #tpu.memory_space<vmem>>, vector<1x1x32xf32>
    %130 = vector.shape_cast %129 : vector<1x1x32xf32> to vector<1x32xf32>
    %131 = vector.broadcast %130 : vector<1x32xf32> to vector<16x32xf32>
    %132 = arith.addf %128, %131 : vector<16x32xf32>
    %133 = arith.truncf %132 : vector<16x32xf32> to vector<16x32xbf16>
    %c0_45 = arith.constant 0 : index
    %c0_46 = arith.constant 0 : index
    %c0_47 = arith.constant 0 : index
    %134 = vector.load %arg10[%c0_45, %c0_46, %c0_47] : memref<1x32x128xbf16, #tpu.memory_space<vmem>>, vector<1x32x128xbf16>
    %135 = vector.shape_cast %134 : vector<1x32x128xbf16> to vector<32x128xbf16>
    %cst_48 = arith.constant dense<0.000000e+00> : vector<16x128xf32>
    %136 = tpu.matmul %133, %135, %cst_48 {dimension_numbers = #tpu.dot_dimension_numbers<[1], [0], [0], [1], [0, 0, 1, 1], [], []>} : vector<16x32xbf16>, vector<32x128xbf16>, vector<16x128xf32> -> vector<16x128xf32>
    %c0_49 = arith.constant 0 : index
    %c0_50 = arith.constant 0 : index
    %c0_51 = arith.constant 0 : index
    %137 = vector.load %arg11[%c0_49, %c0_50, %c0_51] : memref<1x1x128xf32, #tpu.memory_space<vmem>>, vector<1x1x128xf32>
    %138 = vector.shape_cast %137 : vector<1x1x128xf32> to vector<1x128xf32>
    %139 = vector.broadcast %138 : vector<1x128xf32> to vector<16x128xf32>
    %140 = arith.addf %136, %139 : vector<16x128xf32>
    %141 = arith.mulf %140, %140 : vector<16x128xf32>
    %142 = arith.mulf %140, %141 : vector<16x128xf32>
    %cst_52 = arith.constant 4.471500e-02 : f32
    %143 = vector.broadcast %cst_52 : f32 to vector<16x128xf32>
    %144 = arith.mulf %143, %142 : vector<16x128xf32>
    %145 = arith.addf %140, %144 : vector<16x128xf32>
    %cst_53 = arith.constant 0.797884583 : f32
    %146 = vector.broadcast %cst_53 : f32 to vector<16x128xf32>
    %147 = arith.mulf %146, %145 : vector<16x128xf32>
    %148 = math.tanh %147 : vector<16x128xf32>
    %cst_54 = arith.constant 1.000000e+00 : f32
    %149 = vector.broadcast %cst_54 : f32 to vector<16x128xf32>
    %150 = arith.addf %149, %148 : vector<16x128xf32>
    %cst_55 = arith.constant 5.000000e-01 : f32
    %151 = vector.broadcast %cst_55 : f32 to vector<16x128xf32>
    %152 = arith.mulf %151, %150 : vector<16x128xf32>
    %153 = arith.mulf %140, %152 : vector<16x128xf32>
    %154 = arith.truncf %153 : vector<16x128xf32> to vector<16x128xbf16>
    %c0_56 = arith.constant 0 : index
    %c0_57 = arith.constant 0 : index
    %c0_58 = arith.constant 0 : index
    %155 = vector.load %arg12[%c0_56, %c0_57, %c0_58] : memref<1x128x32xbf16, #tpu.memory_space<vmem>>, vector<1x128x32xbf16>
    %156 = vector.shape_cast %155 : vector<1x128x32xbf16> to vector<128x32xbf16>
    %cst_59 = arith.constant dense<0.000000e+00> : vector<16x32xf32>
    %157 = tpu.matmul %154, %156, %cst_59 {dimension_numbers = #tpu.dot_dimension_numbers<[1], [0], [0], [1], [0, 0, 1, 1], [], []>} : vector<16x128xbf16>, vector<128x32xbf16>, vector<16x32xf32> -> vector<16x32xf32>
    %c0_60 = arith.constant 0 : index
    %c0_61 = arith.constant 0 : index
    %c0_62 = arith.constant 0 : index
    %158 = vector.load %arg13[%c0_60, %c0_61, %c0_62] : memref<1x1x32xf32, #tpu.memory_space<vmem>>, vector<1x1x32xf32>
    %159 = vector.shape_cast %158 : vector<1x1x32xf32> to vector<1x32xf32>
    %160 = vector.broadcast %159 : vector<1x32xf32> to vector<16x32xf32>
    %161 = arith.addf %157, %160 : vector<16x32xf32>
    %162 = arith.addf %106, %161 : vector<16x32xf32>
    %c0_63 = arith.constant 0 : index
    %c0_64 = arith.constant 0 : index
    %163 = vector.load %arg17[%c0_63, %c0_64] : memref<16x32xf32, #tpu.memory_space<vmem>>, vector<16x32xf32>
    tpu.vector_store %arg17[%c0_63, %c0_64], %162 {strides = array<i32>} : memref<16x32xf32, #tpu.memory_space<vmem>>, vector<16x32xf32>,
    %c1_i32 = arith.constant 1 : i32
    %164 = arith.cmpi eq, %arg1, %c1_i32 : i32
    %165 = arith.extui %164 : i1 to i32
    %c0_i32_65 = arith.constant 0 : i32
    %166 = arith.cmpi ne, %165, %c0_i32_65 : i32
    scf.if %166 {
      %c0_66 = arith.constant 0 : index
      %c0_67 = arith.constant 0 : index
      %c0_68 = arith.constant 0 : index
      %167 = vector.load %arg16[%c0_66, %c0_67, %c0_68] : memref<1x16x32xf32, #tpu.memory_space<vmem>>, vector<1x16x32xf32>
      %168 = vector.shape_cast %167 : vector<1x16x32xf32> to vector<16x32xf32>
      %169 = vector.shape_cast %162 : vector<16x32xf32> to vector<1x16x32xf32>
      tpu.vector_store %arg16[%c0_66, %c0_67, %c0_68], %169 {strides = array<i32>} : memref<1x16x32xf32, #tpu.memory_space<vmem>>, vector<1x16x32xf32>,
    } else {
    }
    return
  }
  func.func @transform_0(%arg0: i32, %arg1: i32) -> (i32, i32, i32) {
    %c0_i32 = arith.constant 0 : i32
    %c0_i32_0 = arith.constant 0 : i32
    %c0_i32_1 = arith.constant 0 : i32
    return %arg0, %c0_i32, %c0_i32_0 : i32, i32, i32
  }
  func.func @transform_1(%arg0: i32, %arg1: i32) -> (i32, i32, i32) {
    %c0_i32 = arith.constant 0 : i32
    %c0_i32_0 = arith.constant 0 : i32
    %c0_i32_1 = arith.constant 0 : i32
    return %arg0, %c0_i32, %c0_i32_0 : i32, i32, i32
  }
  func.func @transform_2(%arg0: i32, %arg1: i32) -> (i32, i32, i32) {
    %c0_i32 = arith.constant 0 : i32
    %c0_i32_0 = arith.constant 0 : i32
    %c0_i32_1 = arith.constant 0 : i32
    return %arg1, %c0_i32, %c0_i32_0 : i32, i32, i32
  }
  func.func @transform_3(%arg0: i32, %arg1: i32) -> (i32, i32, i32) {
    %c0_i32 = arith.constant 0 : i32
    %c0_i32_0 = arith.constant 0 : i32
    %c0_i32_1 = arith.constant 0 : i32
    return %arg1, %c0_i32, %c0_i32_0 : i32, i32, i32
  }
  func.func @transform_4(%arg0: i32, %arg1: i32) -> (i32, i32, i32) {
    %c0_i32 = arith.constant 0 : i32
    %c0_i32_0 = arith.constant 0 : i32
    %c0_i32_1 = arith.constant 0 : i32
    return %arg1, %c0_i32, %c0_i32_0 : i32, i32, i32
  }
  func.func @transform_5(%arg0: i32, %arg1: i32) -> (i32, i32, i32) {
    %c0_i32 = arith.constant 0 : i32
    %c0_i32_0 = arith.constant 0 : i32
    %c0_i32_1 = arith.constant 0 : i32
    return %arg1, %c0_i32, %c0_i32_0 : i32, i32, i32
  }
  func.func @transform_6(%arg0: i32, %arg1: i32) -> (i32, i32, i32) {
    %c0_i32 = arith.constant 0 : i32
    %c0_i32_0 = arith.constant 0 : i32
    %c0_i32_1 = arith.constant 0 : i32
    return %arg1, %c0_i32, %c0_i32_0 : i32, i32, i32
  }
  func.func @transform_7(%arg0: i32, %arg1: i32) -> (i32, i32, i32) {
    %c0_i32 = arith.constant 0 : i32
    %c0_i32_0 = arith.constant 0 : i32
    %c0_i32_1 = arith.constant 0 : i32
    return %arg1, %c0_i32, %c0_i32_0 : i32, i32, i32
  }
  func.func @transform_8(%arg0: i32, %arg1: i32) -> (i32, i32, i32) {
    %c0_i32 = arith.constant 0 : i32
    %c0_i32_0 = arith.constant 0 : i32
    %c0_i32_1 = arith.constant 0 : i32
    return %arg1, %c0_i32, %c0_i32_0 : i32, i32, i32
  }
  func.func @transform_9(%arg0: i32, %arg1: i32) -> (i32, i32, i32) {
    %c0_i32 = arith.constant 0 : i32
    %c0_i32_0 = arith.constant 0 : i32
    %c0_i32_1 = arith.constant 0 : i32
    return %arg1, %c0_i32, %c0_i32_0 : i32, i32, i32
  }
  func.func @transform_10(%arg0: i32, %arg1: i32) -> (i32, i32, i32) {
    %c0_i32 = arith.constant 0 : i32
    %c0_i32_0 = arith.constant 0 : i32
    %c0_i32_1 = arith.constant 0 : i32
    return %arg1, %c0_i32, %c0_i32_0 : i32, i32, i32
  }
  func.func @transform_11(%arg0: i32, %arg1: i32) -> (i32, i32, i32) {
    %c0_i32 = arith.constant 0 : i32
    %c0_i32_0 = arith.constant 0 : i32
    %c0_i32_1 = arith.constant 0 : i32
    return %arg1, %c0_i32, %c0_i32_0 : i32, i32, i32
  }
  func.func @transform_12(%arg0: i32, %arg1: i32) -> (i32, i32, i32) {
    %c0_i32 = arith.constant 0 : i32
    %c0_i32_0 = arith.constant 0 : i32
    %c0_i32_1 = arith.constant 0 : i32
    return %arg1, %c0_i32, %c0_i32_0 : i32, i32, i32
  }
  func.func @transform_13(%arg0: i32, %arg1: i32) -> (i32, i32, i32) {
    %c0_i32 = arith.constant 0 : i32
    %c0_i32_0 = arith.constant 0 : i32
    %c0_i32_1 = arith.constant 0 : i32
    return %arg1, %c0_i32, %c0_i32_0 : i32, i32, i32
  }
  func.func @transform_14(%arg0: i32, %arg1: i32) -> (i32, i32, i32) {
    %c0_i32 = arith.constant 0 : i32
    %c0_i32_0 = arith.constant 0 : i32
    %c0_i32_1 = arith.constant 0 : i32
    return %arg0, %c0_i32, %c0_i32_0 : i32, i32, i32
  }
}

</mosaic_0001>

<bundles_post_ra>
// kernel: tpu_custom_call.1
= control target key start
LH: loop header
LB: loop body
LE: loop exit
PB: predicated region body
PF: predicated region fallthrough
CT: control target
= control target key end

     0   :  { %s2857_s0 = inlined_call_operand.vmem [shape: f32[2,16,32], index: 0, kind: input, shape index: {}]   ;;  %s2858_s1 = inlined_call_operand.vmem [shape: f32[2,1,16], index: 1, kind: input, shape index: {}]   ;;  %s2859_s2 = inlined_call_operand.vmem [shape: bf16[2,32,96], index: 2, kind: input, shape index: {}]   ;;  %s2860_s3 = inlined_call_operand.vmem [shape: f32[2,1,96], index: 3, kind: input, shape index: {}]   ;;  %s2861_s4 = inlined_call_operand.vmem [shape: bf16[2,32,32], index: 4, kind: input, shape index: {}]   ;;  %s2862_s5 = inlined_call_operand.vmem [shape: f32[2,1,32], index: 5, kind: input, shape index: {}]   ;;  %s2863_s6 = inlined_call_operand.vmem [shape: f32[2,1,32], index: 6, kind: input, shape index: {}]   ;;  %s2864_s7 = inlined_call_operand.vmem [shape: f32[2,1,32], index: 7, kind: input, shape index: {}]   ;;  %s2865_s8 = inlined_call_operand.vmem [shape: bf16[2,32,128], index: 8, kind: input, shape index: {}]   ;;  %s2866_s9 = inlined_call_operand.vmem [shape: f32[2,1,128], index: 9, kind: input, shape index: {}]   ;;  %s2867_s10 = inlined_call_operand.vmem [shape: bf16[2,128,32], index: 10, kind: input, shape index: {}]   ;;  %s2868_s11 = inlined_call_operand.vmem [shape: f32[2,1,32], index: 11, kind: input, shape index: {}]   ;;  %s2869_s12 = inlined_call_operand.vmem [shape: f32[2,1,32], index: 12, kind: input, shape index: {}]   ;;  %s2870_s13 = inlined_call_operand.vmem [shape: f32[2,1,32], index: 13, kind: input, shape index: {}]   ;;  %s2871_s14 = inlined_call_operand.hbm [shape: f32[2,16,32], index: 14, kind: output, shape index: {}]  }
   0x1   :  { %2888 = sst [smem:[#allocation20_spill]] %s2857_s0 }
   0x2   :  { %2889 = sst [smem:[#allocation21_spill]] %s2858_s1 }
   0x3   :  { %2890 = sst [smem:[#allocation22_spill]] %s2859_s2 }
   0x4   :  { %2891 = sst [smem:[#allocation23_spill]] %s2861_s4 }
   0x5   :  { %2892 = sst [smem:[#allocation24_spill]] %s2865_s8 }
   0x6   :  { %2893 = sst [smem:[#allocation25_spill]] %s2869_s12 }
   0x7   :  { %2894 = sst [smem:[#allocation26_spill]] %s2870_s13 }
   0x8   :  { %2895 = sst [smem:[#allocation27_spill]] %s2871_s14 }
   0x9   :  { %19 = vsyncpa [#allocation4], 0 }
   0xa   :  { %21 = vsyncpa [#allocation4 + $0x1], 0  ;;  %s2449_s29 = smov 0   ;;  %s2451_s30 = smov 0  }
   0xb   :  { %s2453_s15 = smov 0   ;;  %s2455_s16 = smov 0  }
   0xc   :  { %s2457_s17 = smov 0   ;;  %s2459_s18 = smov 0  }
   0xd   :  { %s2461_s19 = smov 0   ;;  %s2463_s20 = smov 0  }
   0xe LB: > { %2896 = sst [smem:[#allocation6_spill]] %s2332_s29  ;;  %s1909_s21 = sadd.s32 4294967295, %s2360_s20   ;;  %s2360_s20 = sphi %s2463_s20, %s27_s20   ;;  %s2356_s19 = sphi %s2461_s19, %s2945_s19   ;;  %s2352_s18 = sphi %s2459_s18, %s2944_s18   ;;  %s2348_s17 = sphi %s2457_s17, %s2943_s17   ;;  %s2344_s16 = sphi %s2455_s16, %s2942_s16   ;;  %s2340_s15 = sphi %s2453_s15, %s2941_s15   ;;  %s2336_s30 = sphi %s2451_s30, %s2940_s30   ;;  %s2332_s29 = sphi %s2449_s29, %s2939_s29  }
   0xf   : > { %2897 = sst [smem:[#allocation7_spill]] %s2336_s30  ;;  %s1910_s22 = sadd.s32 4294967294, %s2360_s20  }
  0x10   : > { %2898 = sst [smem:[#allocation8_spill]] %s2340_s15  ;;  %s36_s23 = sadd.s32 1, %s2352_s18 }
  0x11   : > { %2899 = sst [smem:[#allocation9_spill]] %s2344_s16  ;;  %p37_p0 = scmp.ge.s32.totalorder %s36_s23, 2 }
  0x12   : > { %2900 = sst [smem:[#allocation10_spill]] %s2348_s17  ;;  %s39_s24 = sadd.s32 1, %s2356_s19 }
  0x13   : > { %2901 = sst [smem:[#allocation11_spill]] %s2352_s18  ;;  %p420_p1 = scmp.ne.s32.totalorder %s2340_s15, %s2336_s30 }
  0x14   : > { %2902 = sst [smem:[#allocation12_spill]] %s2356_s19  ;;  %p421_p2 = scmp.eq.s32.totalorder %s1909_s21, 3 }
  0x15   : > { %2903 = sst [smem:[#allocation13_spill]] %s2360_s20  ;;  %s2947_s23 = smov (%p37_p0, %s36_s23), 0 }
  0x16   : > { %2904 = sst [smem:[#allocation14_spill]] %s2947_s23  ;;  %s2949_s24 = smov (!%p37_p0, %s39_s24), %s2356_s19 }
  0x17   : > { %p2498_p3 = por %p421_p2, %p420_p1  ;;  %p426_p4 = scmp.ne.s32.totalorder %s2336_s30, %s2332_s29 }
  0x18   : > { %p41_p5 = scmp.ge.s32.totalorder %s2949_s24, 2  ;;  %p427_p6 = scmp.eq.s32.totalorder %s1910_s22, 3 }
  0x19   : > { %s2905_s25 = scalar_select %p2498_p3, 1, 0 }
  0x1a   : > { %p1913_p7 = scmp.ge.s32.totalorder %s2360_s20, 1  ;;  %p539_p8 = scmp.lt.s32.totalorder %s2360_s20, 5 }
  0x1b   : > { %2906 = sst [smem:[#allocation15_spill]] %s2905_s25  ;;  %s2951_s24 = smov (%p41_p5, %s2949_s24), 0 }
  0x1c   : > { %2907 = sst [smem:[#allocation16_spill]] %s2951_s24  ;;  %p2508_p9 = por %p427_p6, %p426_p4 }
  0x1d   : > { %p540_p10 = pnand %p1913_p7, %p539_p8  ;;  %s407_s27 = ssub.s32 %s2356_s19, %s2951_s24 }
  0x1e   : > { %s2908_s26 = scalar_select %p2508_p9, 1, 0 }
  0x1f   : > { %s410_s28 = sadd.s32 1, %s2340_s15  ;;  %p408_p11 = scmp.eq.s32.totalorder %s407_s27, 0 }
  0x20   : > { %2909 = sst [smem:[#allocation17_spill]] %s2908_s26  ;;  %543 = sbr.rel (%p540_p10) target bundleno = 2638 (0xa4e), region = 76 }
  0x21   : > { %s2516_s21 = scalar_select %p408_p11, %s2340_s15, %s410_s28  }
  0x23   : > { %2910 = sst [smem:[#allocation18_spill]] %s2516_s21 }
  0x25   : > { %s2875_s22 = sand.u32 1, %s2336_s30   ;;  %p632_p12 = scmp.lt.s32.totalorder %s2348_s17, 1 }
  0x26   : > { %s1914_s23 = sshll.u32 %s2875_s22, 4  ;;  %p640_p13 = scmp.lt.s32.totalorder %s2344_s16, 1 }
  0x27   : > { %s2524_s18 = scalar_select %p632_p12, %s2348_s17, 1 }
  0x28   : > { %s2527_s24 = scalar_select %p640_p13, %s2344_s16, 1 }
  0x29   : > { %s1966_s27 = sshll.u32 %s2524_s18, 4  ;;  %s2912_s0 = sld [smem:[#allocation20_spill]] }
  0x2a   : > { %s1967_s29 = sshll.u32 %s2527_s24, 4  ;;  %s2913_s2 = sld [smem:[#allocation22_spill]] }
  0x2b   : > { %s2914_s4 = sld [smem:[#allocation23_spill]]  ;;  %s669_s16 = scalar_lea.vmem %s2866_s9, %s2527_s24 }
  0x2c   : > { %s2915_s8 = sld [smem:[#allocation24_spill]]  ;;  %s677_s15 = scalar_lea.vmem %s2868_s11, %s2527_s24 }
  0x2d   : > { %s2591_s12 = scalar_lea.vmem [#allocation3], %s1914_s23  ;;  %s2919_s13 = sld [smem:[#allocation9_spill]] }
  0x2f   : > { %s636_s26 = scalar_lea.vmem %s2912_s0, %s1966_s27 }
  0x30   : > { %s2541_s25 = scalar_lea.vmem %s2913_s2, %s1967_s29  ;;  %s2917_s2 = sld [smem:[#allocation25_spill]] }
  0x31   : > { %s2550_s19 = scalar_lea.vmem %s2914_s4, %s1967_s29  ;;  %s1970_s4 = sshll.u32 %s2527_s24, 6 }
  0x32   : > { %s2567_s17 = scalar_lea.vmem %s2915_s8, %s1967_s29  ;;  %s2581_s0 = scalar_lea.vmem %s2867_s10, %s1970_s4 }
  0x33   : > { %2916 = sst [smem:[#allocation19_spill]] %s2567_s17  ;;  %p1925_p0 = scmp.ne.s32.totalorder %s2919_s13, 0 }
  0x34   : > { %s2918_s8 = sld [smem:[#allocation26_spill]] }
  0x36   : > { %s680_s1 = scalar_lea.vmem %s2917_s2, %s2527_s24  ;;  %688 = sbr.rel (%p1925_p0) target bundleno = 61 (0x3d), region = 80 }
  0x3a   : > { %s683_s17 = scalar_lea.vmem %s2918_s8, %s2527_s24 }
  0x3b   : > { %v689_v0 = vld [vmem:[%s636_s26] sm:$0xff]  ;;  %vm691_vm0 = vcmask 261120   ;;  %v690_v1 = vld [vmem:[%s636_s26 + $0x8] sm:$0xff] }
  0x3c   : > { %692 = vst.msk [vmem:[#allocation2] sm:$0xff] %vm691_vm0, %v689_v0  ;;  %693 = vst.msk [vmem:[#allocation2 + $0x8] sm:$0xff] %vm691_vm0, %v690_v1 }
  0x3d PF: > { %vm697_vm1 = vcmask 261120   ;;  %v2210_v16 = vld [vmem:[%s2541_s25 + $0x8] sm:$0xff]   ;;  %v2362_v17 = vmov 0.0   ;;  %vm2363_vm2 = vmmov 0   ;;  %v2211_v18 = vld [vmem:[%s2541_s25] sm:$0xff]   ;;  %s2920_s8 = scalar_lea.vmem %s2863_s6, %s2527_s24  ;;  %s2921_s26 = scalar_lea.vmem %s2864_s7, %s2527_s24  ;;  %vm838_vm3 = vcmask 64512  }
  0x3e   : > { %2006 = vmatprep.subr.bf16.mxu0 %v2362_v17  ;;  %2010 = vmatprep.mubr.msk.bf16.mxu0 %vm2363_vm2, %v2362_v17  ;;  %v1926_v27 = vld [vmem:[%s2920_s8] ss:$0 sm:$0xff]  ;;  %s2922_s21 = scalar_lea.vmem %s2860_s3, %s2527_s24  ;;  %s2364_s27 = smov 112   ;;  %vm1058_vm4 = vcmask 130048   ;;  %vm1367_vm5 = vcmask 195584  }
  0x3f   : > { %2007 = vmatpush3.bf16.msra.mxu0 %v2210_v16  ;;  %2026 = vmatprep.subr.bf16.mxu1 %v2362_v17  ;;  %v1927_v31 = vld [vmem:[%s2921_s26] ss:$0 sm:$0xff]  ;;  %s2365_s14 = smov 120   ;;  %s2366_s20 = smov 104  }
  0x40   : > { %2008 = vmatprep.subr.bf16.mxu0 %v2362_v17  ;;  %2028 = vmatprep.mubr.msk.bf16.mxu1 %vm2363_vm2, %v2362_v17  ;;  %v1928_v37 = vld [vmem:[%s2922_s21] ss:$0 sm:$0xff]  ;;  %s2367_s29 = smov 96   ;;  %s2923_s2 = sld [smem:[#allocation21_spill]] }
  0x41   : > { %s2369_s8 = smov 8   ;;  %s2370_s23 = smov 16  }
  0x42   : > { %s2925_s22 = scalar_lea.vmem %s2862_s5, %s2527_s24  ;;  %s2926_s28 = sld [smem:[#allocation19_spill]] }
  0x43   : > { %v2594_v2 = vld [vmem:[#allocation2] sm:$0xff]  ;;  %v2596_v3 = vld [vmem:[#allocation2 + $0x8] sm:$0xff]  ;;  %2009 = vmatpush3.bf16.msra.mxu0 %v2211_v18  ;;  %s2929_s13 = sld [smem:[#allocation9_spill]] }
  0x44   : > { %v698_v4 = vsel %vm697_vm1, %v2594_v2, 0.0  ;;  %v701_v5 = vsel %vm697_vm1, %v2596_v3, 0.0  ;;  %2014 = vmatprep.subr.bf16.mxu0 %v2362_v17 }
  0x45   : > { %699 = vadd.xlane.f32.xlu0 %v698_v4 }
  0x46   : > { %s2924_s4 = scalar_lea.vmem %s2923_s2, %s2524_s18  ;;  %s2368_s18 = smov 64  }
  0x47   : > { %v1936_v4 = vld [vmem:[%s2924_s4] ss:$0 sm:$0xff] }
  0x49   : > { %702 = vadd.xlane.f32.xlu0 %v701_v5  ;;  %p1960_p1 = scmp.ne.s32.totalorder %s2929_s13, 1 }
  0xce   : > { %v700_v6 = vpop.xlane.xlu0 %699 }
  0xcf   : > { %v705_v7 = vmul.f32 0.03125, %v700_v6 }
  0xd1   : > { %v707_v8 = vsub.f32 %v2594_v2, %v705_v7 }
  0xd2   : > { %v703_v9 = vpop.xlane.xlu0 %702 }
  0xd3   : > { %v706_v10 = vmul.f32 0.03125, %v703_v9  ;;  %v709_v11 = vmul.f32 %v707_v8, %v707_v8 }
  0xd5   : > { %v708_v12 = vsub.f32 %v2596_v3, %v706_v10  ;;  %v711_v13 = vsel %vm697_vm1, %v709_v11, 0.0 }
  0xd6   : > { %712 = vadd.xlane.f32.xlu1 %v711_v13 }
  0xd7   : > { %v710_v14 = vmul.f32 %v708_v12, %v708_v12 }
  0xd9   : > { %v714_v15 = vsel %vm697_vm1, %v710_v14, 0.0 }
  0xda   : > { %715 = vadd.xlane.f32.xlu1 %v714_v15 }
 0x15f   : > { %v713_v19 = vpop.xlane.xlu1 %712 }
 0x160   : > { %v717_v20 = vmul.f32 0.03125, %v713_v19 }
 0x162   : > { %v719_v21 = vadd.f32 1e-06, %v717_v20 }
 0x163   : > { %v716_v22 = vpop.xlane.xlu1 %715 }
 0x164   : > { %2224 = vrsqrt.f32 %v719_v21  ;;  %v718_v23 = vmul.f32 0.03125, %v716_v22 }
 0x166   : > { %v720_v24 = vadd.f32 1e-06, %v718_v23 }
 0x168   : > { %2226 = vrsqrt.f32 %v720_v24 }
 0x171   : > { %v2225_v25 = vpop.eup %2224 }
 0x172   : > { %v723_v26 = vmul.f32 %v2225_v25, %v707_v8 }
 0x174   : > { %v732_v30 = vmul.f32 %v1926_v27, %v723_v26 }
 0x175   : > { %v2227_v28 = vpop.eup %2226 }
 0x176   : > { %v724_v29 = vmul.f32 %v2227_v28, %v708_v12  ;;  %v741_v33 = vadd.f32 %v1927_v31, %v732_v30 }
 0x178   : > { %v733_v32 = vmul.f32 %v1926_v27, %v724_v29 }
 0x17a   : > { %v742_v34 = vadd.f32 %v1927_v31, %v733_v32 }
 0x17c   : > { %v743_v35 = vpack.c.bf16 %v742_v34, %v741_v33 }
 0x17e   : > { %2011 = vmatmul.mubr.msk.bf16.vlgmr.msra.gmra.mxu0 %vm697_vm1, %v743_v35 }
 0x17f   : > { %2016 = vmatprep.mubr.msk.bf16.mxu0 %vm2363_vm2, %v2362_v17 }
 0x23e   : > { %v804_v36 = vpop.f32.mrf.mxu0 }
 0x23f   : > { %v805_v40 = vadd.f32 %v1928_v37, %v804_v36 }
 0x240   : > { %v2012_v38 = vpop.f32.mrf.mxu0 }
 0x242   : > { %v807_v39 = vpop.f32.mrf.mxu0 }
 0x243   : > { %v808_v41 = vadd.f32 %v1928_v37, %v807_v39 }
 0x244   : > { %v2013_v42 = vpop.f32.mrf.mxu0 }
 0x245   : > { %v2185_v43 = vpack.i.bf16 %v808_v41, %v805_v40  ;;  %v2634_v44 = vpack.c.bf16 %v808_v41, %v805_v40 }
 0x247   : > { %2186 = vrot.lane.b32.xlu1 %v2185_v43, %s2364_s27  ;;  %2181 = vrot.lane.b32.xlu0 %v2185_v43, %s2365_s14 }
 0x24b   : > { %2191 = vrot.lane.b32.xlu1 %v2185_v43, %s2366_s20 }
 0x24f   : > { %836 = vrot.lane.b32.xlu1 %v2634_v44, %s2367_s29 }
 0x2b9   : > { %v2187_v45 = vpop.permute.xlu1 %2186  ;;  %v2182_v46 = vpop.permute.xlu0 %2181 }
 0x2ba   : > { %v2189_v47 = vunpack.i.h.bf16 %v2187_v45  ;;  %v2188_v48 = vunpack.i.l.bf16 %v2187_v45  ;;  %v2184_v49 = vunpack.i.h.bf16 %v2182_v46  ;;  %v2183_v50 = vunpack.i.l.bf16 %v2182_v46 }
 0x2bc   : > { %v2637_v51 = vpack.c.bf16 %v2189_v47, %v2188_v48  ;;  %v2639_v52 = vpack.c.bf16 %v2184_v49, %v2183_v50 }
 0x2bd   : > { %v2192_v53 = vpop.permute.xlu1 %2191 }
 0x2be   : > { %v2194_v54 = vunpack.i.h.bf16 %v2192_v53  ;;  %v2193_v55 = vunpack.i.l.bf16 %v2192_v53  ;;  %887 = vrot.lane.b32.xlu0 %v2639_v52, %s2367_s29  ;;  %937 = vrot.lane.b32.xlu1 %v2637_v51, %s2367_s29 }
 0x2c0   : > { %v2643_v56 = vpack.c.bf16 %v2194_v54, %v2193_v55 }
 0x2c1   : > { %v837_v57 = vpop.permute.xlu1 %836 }
 0x2c2   : > { %v843_v58 = vsel %vm838_vm3, %v837_v57, 0  ;;  %987 = vrot.lane.b32.xlu0 %v2643_v56, %s2367_s29 }
 0x2c3   : > { %2015 = vmatpush3.bf16.xpose.msra.mxu0 %v843_v58 }
 0x2c4   : > { %2020 = vmatprep.subr.bf16.mxu0 %v2362_v17 }
 0x2ca   : > { %2017 = vmatmul.mubr.msk.bf16.vlgmr.msra.gmra.mxu0 %vm838_vm3, %v2634_v44 }
 0x2cb   : > { %2022 = vmatprep.mubr.msk.bf16.mxu0 %vm2363_vm2, %v2362_v17 }
 0x330   : > { %v888_v59 = vpop.permute.xlu0 %887  ;;  %v938_v60 = vpop.permute.xlu1 %937 }
 0x331   : > { %v893_v61 = vsel %vm838_vm3, %v888_v59, 0  ;;  %v943_v62 = vsel %vm838_vm3, %v938_v60, 0 }
 0x332   : > { %2021 = vmatpush3.bf16.xpose.msra.mxu0 %v893_v61  ;;  %2027 = vmatpush3.bf16.xpose.msra.mxu1 %v943_v62 }
 0x333   : > { %2032 = vmatprep.subr.bf16.mxu0 %v2362_v17  ;;  %2038 = vmatprep.subr.bf16.mxu1 %v2362_v17 }
 0x334   : > { %v988_v63 = vpop.permute.xlu0 %987 }
 0x335   : > { %v993_v0 = vsel %vm838_vm3, %v988_v63, 0 }
 0x339   : > { %2023 = vmatmul.mubr.msk.bf16.vlgmr.msra.gmra.mxu0 %vm838_vm3, %v2639_v52  ;;  %2029 = vmatmul.mubr.msk.bf16.vlgmr.msra.gmra.mxu1 %vm838_vm3, %v2637_v51 }
 0x33a   : > { %2033 = vmatpush3.bf16.xpose.msra.mxu0 %v993_v0  ;;  %2034 = vmatprep.mubr.msk.bf16.mxu0 %vm2363_vm2, %v2362_v17 }
 0x33b   : > { %2040 = vmatprep.mubr.msk.bf16.mxu1 %vm2363_vm2, %v2362_v17  ;;  %2044 = vmatprep.subr.bf16.mxu0 %v2362_v17 }
 0x341   : > { %2035 = vmatmul.mubr.msk.bf16.vlgmr.msra.gmra.mxu0 %vm838_vm3, %v2643_v56 }
 0x342   : > { %2046 = vmatprep.mubr.msk.bf16.mxu0 %vm2363_vm2, %v2362_v17 }
 0x38a   : > { %v879_v1 = vpop.f32.mrf.mxu0 }
 0x38b   : > { %v1036_v5 = vmul.f32 0.35355338, %v879_v1 }
 0x38c   : > { %v2018_v6 = vpop.f32.mrf.mxu0 }
 0x38d   : > { %v1050_v7 = vadd.f32 %v1936_v4, %v1036_v5 }
 0x38e   : > { %v882_v8 = vpop.f32.mrf.mxu0 }
 0x38f   : > { %v1037_v9 = vmul.f32 0.35355338, %v882_v8  ;;  %v1059_v10 = vsel %vm1058_vm4, %v1050_v7, -inf }
 0x390   : > { %1060 = vmax.xlane.f32.xlu1 %v1059_v10  ;;  %v2019_v11 = vpop.f32.mrf.mxu0 }
 0x391   : > { %v1051_v12 = vadd.f32 %v1936_v4, %v1037_v9 }
 0x393   : > { %v1062_v13 = vsel %vm1058_vm4, %v1051_v12, -inf }
 0x394   : > { %1063 = vmax.xlane.f32.xlu0 %v1062_v13 }
 0x3f9   : > { %v929_v14 = vpop.f32.mrf.mxu0  ;;  %v979_v15 = vpop.f32.mrf.mxu1 }
 0x3fa   : > { %v1038_v16 = vmul.f32 0.35355338, %v929_v14  ;;  %v1040_v18 = vmul.f32 0.35355338, %v979_v15 }
 0x3fb   : > { %v2024_v19 = vpop.f32.mrf.mxu0  ;;  %v2030_v20 = vpop.f32.mrf.mxu1 }
 0x3fc   : > { %v1054_v21 = vadd.f32 %v1936_v4, %v1040_v18  ;;  %v1052_v22 = vadd.f32 %v1936_v4, %v1038_v16 }
 0x3fd   : > { %v932_v23 = vpop.f32.mrf.mxu0  ;;  %v982_v24 = vpop.f32.mrf.mxu1 }
 0x3fe   : > { %v1039_v25 = vmul.f32 0.35355338, %v932_v23  ;;  %v1041_v26 = vmul.f32 0.35355338, %v982_v24  ;;  %v1071_v27 = vsel %vm1058_vm4, %v1054_v21, -inf  ;;  %v1065_v28 = vsel %vm1058_vm4, %v1052_v22, -inf }
 0x3ff   : > { %v2031_v29 = vpop.f32.mrf.mxu1  ;;  %1072 = vmax.xlane.f32.xlu1 %v1071_v27  ;;  %1066 = vmax.xlane.f32.xlu0 %v1065_v28  ;;  %v2025_v30 = vpop.f32.mrf.mxu0 }
 0x400   : > { %v1053_v31 = vadd.f32 %v1936_v4, %v1039_v25  ;;  %v1055_v35 = vadd.f32 %v1936_v4, %v1041_v26 }
 0x401   : > { %v1029_v32 = vpop.f32.mrf.mxu0 }
 0x402   : > { %v1042_v33 = vmul.f32 0.35355338, %v1029_v32  ;;  %v1068_v34 = vsel %vm1058_vm4, %v1053_v31, -inf  ;;  %v1074_v40 = vsel %vm1058_vm4, %v1055_v35, -inf }
 0x403   : > { %1069 = vmax.xlane.f32.xlu0 %v1068_v34  ;;  %v2036_v36 = vpop.f32.mrf.mxu0 }
 0x404   : > { %v1056_v37 = vadd.f32 %v1936_v4, %v1042_v33 }
 0x405   : > { %v1032_v38 = vpop.f32.mrf.mxu0 }
 0x406   : > { %v1043_v39 = vmul.f32 0.35355338, %v1032_v38  ;;  %v1077_v41 = vsel %vm1058_vm4, %v1056_v37, -inf }
 0x407   : > { %1075 = vmax.xlane.f32.xlu0 %v1074_v40  ;;  %1078 = vmax.xlane.f32.xlu1 %v1077_v41  ;;  %v2037_v42 = vpop.f32.mrf.mxu0 }
 0x408   : > { %v1057_v43 = vadd.f32 %v1936_v4, %v1043_v39 }
 0x40a   : > { %v1080_v45 = vsel %vm1058_vm4, %v1057_v43, -inf }
 0x40b   : > { %1081 = vmax.xlane.f32.xlu0 %v1080_v45 }
 0x418   : > { %1151 = vrot.lane.b32.xlu1 %v2634_v44, %s2368_s18 }
 0x419   : > { %v1061_v48 = vpop.xlane.xlu1 %1060 }
 0x41a   : > { %v1083_v50 = vsub.f32 %v1050_v7, %v1061_v48 }
 0x41c   : > { %v1091_v53 = vmul.f32 1.442695, %v1083_v50 }
 0x41d   : > { %v1064_v46 = vpop.xlane.xlu0 %1063 }
 0x41e   : > { %v1084_v47 = vsub.f32 %v1051_v12, %v1064_v46 }
 0x420   : > { %v1093_v49 = vmul.f32 1.442695, %v1084_v47 }
 0x422   : > { %2228 = vpow2.f32 %v1093_v49 }
 0x423   : > { %2230 = vpow2.f32 %v1091_v53 }
 0x42f   : > { %v2229_v54 = vpop.eup %2228 }
 0x430   : > { %v1110_v55 = vsel %vm1058_vm4, %v2229_v54, 0.0  ;;  %v2231_v57 = vpop.eup %2230 }
 0x431   : > { %1111 = vadd.xlane.f32.xlu0 %v1110_v55  ;;  %v1107_v58 = vsel %vm1058_vm4, %v2231_v57, 0.0 }
 0x43c   : > { %1108 = vadd.xlane.f32.xlu1 %v1107_v58 }
 0x488   : > { %v1073_v59 = vpop.xlane.xlu1 %1072  ;;  %v1067_v60 = vpop.xlane.xlu0 %1066 }
 0x489   : > { %v1087_v61 = vsub.f32 %v1054_v21, %v1073_v59  ;;  %v1085_v44 = vsub.f32 %v1052_v22, %v1067_v60 }
 0x48b   : > { %v1095_v62 = vmul.f32 1.442695, %v1085_v44  ;;  %v1099_v63 = vmul.f32 1.442695, %v1087_v61 }
 0x48c   : > { %v1070_v0 = vpop.xlane.xlu0 %1069 }
 0x48d   : > { %v1086_v1 = vsub.f32 %v1053_v31, %v1070_v0  ;;  %2232 = vpow2.f32 %v1095_v62 }
 0x48e   : > { %2234 = vpow2.f32 %v1099_v63  ;;  %v2212_v63 = vld [vmem:[%s2550_s19 + $0x8] sm:$0xff]  }
 0x48f   : > { %v1097_v4 = vmul.f32 1.442695, %v1086_v1 }
 0x490   : > { %v1076_v5 = vpop.xlane.xlu0 %1075  ;;  %v1079_v6 = vpop.xlane.xlu1 %1078 }
 0x491   : > { %2236 = vpow2.f32 %v1097_v4  ;;  %v1088_v7 = vsub.f32 %v1055_v35, %v1076_v5  ;;  %v1089_v8 = vsub.f32 %v1056_v37, %v1079_v6  ;;  %v2213_v4 = vld [vmem:[%s2550_s19] sm:$0xff]   ;;  %s2371_s19 = smov 24  }
 0x493   : > { %v1101_v9 = vmul.f32 1.442695, %v1088_v7  ;;  %v1103_v10 = vmul.f32 1.442695, %v1089_v8 }
 0x494   : > { %v1152_v11 = vpop.permute.xlu1 %1151  ;;  %v1082_v12 = vpop.xlane.xlu0 %1081 }
 0x495   : > { %2238 = vpow2.f32 %v1101_v9  ;;  %v1090_v13 = vsub.f32 %v1057_v43, %v1082_v12  ;;  %2039 = vmatpush3.bf16.msra.mxu1 %v1152_v11 }
 0x496   : > { %2240 = vpow2.f32 %v1103_v10  ;;  %2050 = vmatprep.subr.bf16.mxu1 %v2362_v17 }
 0x497   : > { %v1105_v14 = vmul.f32 1.442695, %v1090_v13 }
 0x499   : > { %2242 = vpow2.f32 %v1105_v14 }
 0x49a   : > { %v2233_v15 = vpop.eup %2232 }
 0x49b   : > { %v1113_v16 = vsel %vm1058_vm4, %v2233_v15, 0.0  ;;  %v2235_v18 = vpop.eup %2234 }
 0x49c   : > { %1114 = vadd.xlane.f32.xlu1 %v1113_v16  ;;  %v1119_v21 = vsel %vm1058_vm4, %v2235_v18, 0.0 }
 0x49e   : > { %v2237_v19 = vpop.eup %2236 }
 0x49f   : > { %v1116_v20 = vsel %vm1058_vm4, %v2237_v19, 0.0 }
 0x4a0   : > { %1117 = vadd.xlane.f32.xlu0 %v1116_v20  ;;  %1120 = vadd.xlane.f32.xlu1 %v1119_v21 }
 0x4a2   : > { %v2239_v22 = vpop.eup %2238 }
 0x4a3   : > { %v2241_v23 = vpop.eup %2240  ;;  %v1122_v24 = vsel %vm1058_vm4, %v2239_v22, 0.0 }
 0x4a4   : > { %v1125_v25 = vsel %vm1058_vm4, %v2241_v23, 0.0  ;;  %1123 = vadd.xlane.f32.xlu0 %v1122_v24 }
 0x4a5   : > { %1126 = vadd.xlane.f32.xlu1 %v1125_v25 }
 0x4a6   : > { %v2243_v26 = vpop.eup %2242 }
 0x4a7   : > { %v1128_v27 = vsel %vm1058_vm4, %v2243_v26, 0.0 }
 0x4a8   : > { %1129 = vadd.xlane.f32.xlu0 %v1128_v27 }
 0x4b6   : > { %1245 = vrot.lane.b32.xlu1 %v2637_v51, %s2368_s18 }
 0x4ba   : > { %1292 = vrot.lane.b32.xlu1 %v2643_v56, %s2368_s18  ;;  %v1112_v28 = vpop.xlane.xlu0 %1111 }
 0x4bb   : > { %2244 = vrcp.f32 %v1112_v28 }
 0x4be   : > { %1198 = vrot.lane.b32.xlu0 %v2639_v52, %s2368_s18 }
 0x4c5   : > { %v1109_v29 = vpop.xlane.xlu1 %1108 }
 0x4c6   : > { %2246 = vrcp.f32 %v1109_v29 }
 0x4c8   : > { %v2245_v30 = vpop.eup %2244 }
 0x4c9   : > { %v1140_v33 = vmul.f32 %v2245_v30, %v2229_v54 }
 0x4d3   : > { %v2247_v31 = vpop.eup %2246 }
 0x4d4   : > { %v1139_v32 = vmul.f32 %v2247_v31, %v2231_v57 }
 0x4d6   : > { %v1147_v34 = vpack.c.bf16 %v1140_v33, %v1139_v32 }
 0x4d8   : > { %2041 = vmatmul.mubr.msk.bf16.vlgmr.msra.gmra.mxu1 %vm1058_vm4, %v1147_v34 }
 0x4d9   : > { %2052 = vmatprep.mubr.msk.bf16.mxu1 %vm2363_vm2, %v2362_v17 }
 0x525   : > { %v1115_v51 = vpop.xlane.xlu1 %1114 }
 0x526   : > { %2248 = vrcp.f32 %v1115_v51  ;;  %v1941_v51 = vld [vmem:[%s2925_s22] ss:$0 sm:$0xff] }
 0x529   : > { %v1118_v56 = vpop.xlane.xlu0 %1117  ;;  %v1121_v35 = vpop.xlane.xlu1 %1120 }
 0x52a   : > { %2250 = vrcp.f32 %v1118_v56 }
 0x52b   : > { %2252 = vrcp.f32 %v1121_v35 }
 0x52d   : > { %v1124_v52 = vpop.xlane.xlu0 %1123 }
 0x52e   : > { %v1127_v36 = vpop.xlane.xlu1 %1126  ;;  %2254 = vrcp.f32 %v1124_v52 }
 0x52f   : > { %2256 = vrcp.f32 %v1127_v36 }
 0x531   : > { %v1130_v37 = vpop.xlane.xlu0 %1129 }
 0x532   : > { %v1246_v38 = vpop.permute.xlu1 %1245  ;;  %2258 = vrcp.f32 %v1130_v37 }
 0x533   : > { %2051 = vmatpush3.bf16.msra.mxu1 %v1246_v38  ;;  %v2249_v39 = vpop.eup %2248 }
 0x534   : > { %2062 = vmatprep.subr.bf16.mxu1 %v2362_v17  ;;  %v1141_v42 = vmul.f32 %v2249_v39, %v2233_v15 }
 0x535   : > { %v1199_v40 = vpop.permute.xlu0 %1198 }
 0x536   : > { %2045 = vmatpush3.bf16.msra.mxu0 %v1199_v40  ;;  %v1293_v48 = vpop.permute.xlu1 %1292 }
 0x537   : > { %v2251_v41 = vpop.eup %2250  ;;  %2056 = vmatprep.subr.bf16.mxu0 %v2362_v17 }
 0x538   : > { %v1142_v43 = vmul.f32 %v2251_v41, %v2237_v19  ;;  %v2253_v45 = vpop.eup %2252 }
 0x539   : > { %v1143_v49 = vmul.f32 %v2253_v45, %v2235_v18 }
 0x53a   : > { %v1148_v46 = vpack.c.bf16 %v1142_v43, %v1141_v42 }
 0x53b   : > { %v2255_v47 = vpop.eup %2254 }
 0x53c   : > { %2047 = vmatmul.mubr.msk.bf16.vlgmr.msra.gmra.mxu0 %vm1058_vm4, %v1148_v46  ;;  %v1144_v50 = vmul.f32 %v2255_v47, %v2239_v22  ;;  %v2257_v53 = vpop.eup %2256 }
 0x53d   : > { %2057 = vmatpush3.bf16.msra.mxu0 %v1293_v48  ;;  %2058 = vmatprep.mubr.msk.bf16.mxu0 %vm2363_vm2, %v2362_v17  ;;  %v1145_v57 = vmul.f32 %v2257_v53, %v2241_v23 }
 0x53e   : > { %v1149_v54 = vpack.c.bf16 %v1144_v50, %v1143_v49  ;;  %2070 = vmatprep.subr.bf16.mxu0 %v2362_v17 }
 0x53f   : > { %v2259_v55 = vpop.eup %2258 }
 0x540   : > { %2053 = vmatmul.mubr.msk.bf16.vlgmr.msra.gmra.mxu1 %vm1058_vm4, %v1149_v54  ;;  %v1146_v58 = vmul.f32 %v2259_v55, %v2243_v26  ;;  %v2214_v54 = vld [vmem:[%s2926_s28 + $0x8] sm:$0xff]   ;;  %v2215_v55 = vld [vmem:[%s2926_s28] sm:$0xff]  }
 0x541   : > { %2066 = vmatprep.mubr.msk.bf16.mxu1 %vm2363_vm2, %v2362_v17  ;;  %2063 = vmatpush3.bf16.msra.mxu1 %v2212_v63 }
 0x542   : > { %v1150_v59 = vpack.c.bf16 %v1146_v58, %v1145_v57  ;;  %2064 = vmatprep.subr.bf16.mxu1 %v2362_v17 }
 0x544   : > { %2059 = vmatmul.mubr.msk.bf16.vlgmr.msra.gmra.mxu0 %vm1058_vm4, %v1150_v59 }
 0x545   : > { %2074 = vmatprep.mubr.msk.bf16.mxu0 %vm2363_vm2, %v2362_v17  ;;  %2065 = vmatpush3.bf16.msra.mxu1 %v2213_v4 }
 0x546   : > { %2078 = vmatprep.subr.bf16.mxu1 %v2362_v17  ;;  %2071 = vmatpush3.bf16.msra.mxu0 %v2214_v54 }
 0x547   : > { %2072 = vmatprep.subr.bf16.mxu0 %v2362_v17 }
 0x54a   : > { %2073 = vmatpush3.bf16.msra.mxu0 %v2215_v55 }
 0x598   : > { %v1191_v60 = vpop.f32.mrf.mxu1 }
 0x59a   : > { %v2042_v61 = vpop.f32.mrf.mxu1 }
 0x59c   : > { %v1194_v44 = vpop.f32.mrf.mxu1 }
 0x59e   : > { %v2043_v62 = vpop.f32.mrf.mxu1 }
 0x5fc   : > { %v1238_v0 = vpop.f32.mrf.mxu0 }
 0x5fe   : > { %v2048_v1 = vpop.f32.mrf.mxu0 }
 0x600   : > { %v1241_v5 = vpop.f32.mrf.mxu0  ;;  %v1285_v6 = vpop.f32.mrf.mxu1 }
 0x601   : > { %v2195_v7 = vpack.i.bf16 %v1241_v5, %v1238_v0  ;;  %v1945_v0 = vld [vmem:[%s680_s1] ss:$0 sm:$0xff] }
 0x602   : > { %v2049_v8 = vpop.f32.mrf.mxu0  ;;  %v2054_v9 = vpop.f32.mrf.mxu1 }
 0x603   : > { %2196 = vrot.lane.b32.xlu1 %v2195_v7, %s2369_s8 }
 0x604   : > { %v1288_v10 = vpop.f32.mrf.mxu1  ;;  %v1332_v11 = vpop.f32.mrf.mxu0 }
 0x605   : > { %v2200_v12 = vpack.i.bf16 %v1288_v10, %v1285_v6  ;;  %v1946_v6 = vld [vmem:[%s683_s17] ss:$0 sm:$0xff] }
 0x606   : > { %v2055_v13 = vpop.f32.mrf.mxu1  ;;  %v2060_v14 = vpop.f32.mrf.mxu0 }
 0x607   : > { %2201 = vrot.lane.b32.xlu0 %v2200_v12, %s2370_s23  ;;  %v2217_v12 = vld [vmem:[%s2581_s0 + $0x30] sm:$0xff]   ;;  %v2218_v13 = vld [vmem:[%s2581_s0 + $0x28] sm:$0xff]   ;;  %v2219_v14 = vld [vmem:[%s2581_s0 + $0x20] sm:$0xff]  }
 0x608   : > { %v1335_v15 = vpop.f32.mrf.mxu0 }
 0x609   : > { %v2205_v16 = vpack.i.bf16 %v1335_v15, %v1332_v11  ;;  %v2216_v11 = vld [vmem:[%s2581_s0 + $0x38] sm:$0xff]  }
 0x60a   : > { %v2061_v18 = vpop.f32.mrf.mxu0  ;;  %v2220_v15 = vld [vmem:[%s2581_s0 + $0x18] sm:$0xff]  }
 0x60b   : > { %2206 = vrot.lane.b32.xlu1 %v2205_v16, %s2371_s19  ;;  %v2221_v16 = vld [vmem:[%s2581_s0 + $0x10] sm:$0xff]   ;;  %v2222_v18 = vld [vmem:[%s2581_s0 + $0x8] sm:$0xff]  }
 0x675   : > { %v2197_v19 = vpop.permute.xlu1 %2196 }
 0x676   : > { %v2199_v21 = vunpack.i.h.bf16 %v2197_v19  ;;  %v2198_v22 = vunpack.i.l.bf16 %v2197_v19  ;;  %v2223_v19 = vld [vmem:[%s2581_s0] sm:$0xff]  }
 0x678   : > { %v1364_v26 = vsel %vm838_vm3, %v1194_v44, %v2199_v21  ;;  %v1363_v27 = vsel %vm838_vm3, %v1191_v60, %v2198_v22 }
 0x679   : > { %v2202_v20 = vpop.permute.xlu0 %2201 }
 0x67a   : > { %v2204_v23 = vunpack.i.h.bf16 %v2202_v20  ;;  %v2203_v24 = vunpack.i.l.bf16 %v2202_v20  ;;  %v1947_v20 = vld [vmem:[%s669_s16] ss:$0 sm:$0xff] }
 0x67c   : > { %v1365_v30 = vsel %vm1058_vm4, %v1363_v27, %v2203_v24  ;;  %v1366_v31 = vsel %vm1058_vm4, %v1364_v26, %v2204_v23 }
 0x67d   : > { %v2207_v25 = vpop.permute.xlu1 %2206 }
 0x67e   : > { %v2209_v28 = vunpack.i.h.bf16 %v2207_v25  ;;  %v2208_v29 = vunpack.i.l.bf16 %v2207_v25 }
 0x680   : > { %v1369_v32 = vsel %vm1367_vm5, %v1366_v31, %v2209_v28  ;;  %v1368_v33 = vsel %vm1367_vm5, %v1365_v30, %v2208_v29 }
 0x681   : > { %v1370_v34 = vpack.c.bf16 %v1369_v32, %v1368_v33 }
 0x683   : > { %2067 = vmatmul.mubr.msk.bf16.vlgmr.msra.gmra.mxu1 %vm697_vm1, %v1370_v34 }
 0x684   : > { %2094 = vmatprep.mubr.msk.bf16.mxu1 %vm2363_vm2, %v2362_v17  ;;  %2079 = vmatpush3.bf16.msra.mxu1 %v2216_v11 }
 0x685   : > { %2080 = vmatprep.subr.bf16.mxu1 %v2362_v17 }
 0x688   : > { %2081 = vmatpush3.bf16.msra.mxu1 %v2217_v12 }
 0x689   : > { %2082 = vmatprep.subr.bf16.mxu1 %v2362_v17 }
 0x68c   : > { %2083 = vmatpush3.bf16.msra.mxu1 %v2218_v13 }
 0x68d   : > { %2084 = vmatprep.subr.bf16.mxu1 %v2362_v17 }
 0x690   : > { %2085 = vmatpush3.bf16.msra.mxu1 %v2219_v14 }
 0x691   : > { %2086 = vmatprep.subr.bf16.mxu1 %v2362_v17 }
 0x694   : > { %2087 = vmatpush3.bf16.msra.mxu1 %v2220_v15 }
 0x695   : > { %2088 = vmatprep.subr.bf16.mxu1 %v2362_v17 }
 0x698   : > { %2089 = vmatpush3.bf16.msra.mxu1 %v2221_v16 }
 0x699   : > { %2090 = vmatprep.subr.bf16.mxu1 %v2362_v17 }
 0x69c   : > { %2091 = vmatpush3.bf16.msra.mxu1 %v2222_v18 }
 0x69d   : > { %2092 = vmatprep.subr.bf16.mxu1 %v2362_v17 }
 0x6a0   : > { %2093 = vmatpush3.bf16.msra.mxu1 %v2223_v19 }
 0x743   : > { %v1431_v56 = vpop.f32.mrf.mxu1 }
 0x744   : > { %v1432_v35 = vadd.f32 %v1941_v51, %v1431_v56 }
 0x745   : > { %v2068_v52 = vpop.f32.mrf.mxu1 }
 0x746   : > { %v2733_v36 = vadd.f32 %v1432_v35, %v2594_v2 }
 0x747   : > { %v1434_v37 = vpop.f32.mrf.mxu1 }
 0x748   : > { %v1435_v38 = vadd.f32 %v1941_v51, %v1434_v37  ;;  %v1440_v39 = vsel %vm697_vm1, %v2733_v36, 0.0 }
 0x749   : > { %1441 = vadd.xlane.f32.xlu0 %v1440_v39  ;;  %v2069_v40 = vpop.f32.mrf.mxu1 }
 0x74a   : > { %v2738_v41 = vadd.f32 %v1435_v38, %v2596_v3 }
 0x74c   : > { %v1443_v42 = vsel %vm697_vm1, %v2738_v41, 0.0 }
 0x74d   : > { %1444 = vadd.xlane.f32.xlu1 %v1443_v42 }
 0x7d2   : > { %v1442_v43 = vpop.xlane.xlu0 %1441 }
 0x7d3   : > { %v1446_v45 = vmul.f32 0.03125, %v1442_v43 }
 0x7d5   : > { %v1448_v2 = vsub.f32 %v2733_v36, %v1446_v45  ;;  %v1951_v45 = vld [vmem:[%s677_s15] ss:$0 sm:$0xff] }
 0x7d6   : > { %v1445_v46 = vpop.xlane.xlu1 %1444 }
 0x7d7   : > { %v1447_v47 = vmul.f32 0.03125, %v1445_v46  ;;  %v1450_v48 = vmul.f32 %v1448_v2, %v1448_v2 }
 0x7d9   : > { %v1449_v49 = vsub.f32 %v2738_v41, %v1447_v47  ;;  %v1452_v50 = vsel %vm697_vm1, %v1450_v48, 0.0 }
 0x7da   : > { %1453 = vadd.xlane.f32.xlu0 %v1452_v50 }
 0x7db   : > { %v1451_v53 = vmul.f32 %v1449_v49, %v1449_v49 }
 0x7dd   : > { %v1455_v3 = vsel %vm697_vm1, %v1451_v53, 0.0 }
 0x7de   : > { %1456 = vadd.xlane.f32.xlu0 %v1455_v3 }
 0x863   : > { %v1454_v57 = vpop.xlane.xlu0 %1453 }
 0x864   : > { %v1458_v58 = vmul.f32 0.03125, %v1454_v57 }
 0x866   : > { %v1460_v59 = vadd.f32 1e-06, %v1458_v58 }
 0x867   : > { %v1457_v60 = vpop.xlane.xlu0 %1456 }
 0x868   : > { %2260 = vrsqrt.f32 %v1460_v59  ;;  %v1459_v61 = vmul.f32 0.03125, %v1457_v60 }
 0x86a   : > { %v1461_v44 = vadd.f32 1e-06, %v1459_v61 }
 0x86c   : > { %2262 = vrsqrt.f32 %v1461_v44 }
 0x875   : > { %v2261_v62 = vpop.eup %2260 }
 0x876   : > { %v1464_v63 = vmul.f32 %v2261_v62, %v1448_v2 }
 0x878   : > { %v1473_v5 = vmul.f32 %v1945_v0, %v1464_v63 }
 0x879   : > { %v2263_v1 = vpop.eup %2262 }
 0x87a   : > { %v1465_v4 = vmul.f32 %v2263_v1, %v1449_v49  ;;  %v1482_v8 = vadd.f32 %v1946_v6, %v1473_v5 }
 0x87c   : > { %v1474_v7 = vmul.f32 %v1945_v0, %v1465_v4 }
 0x87e   : > { %v1483_v9 = vadd.f32 %v1946_v6, %v1474_v7 }
 0x880   : > { %v1484_v10 = vpack.c.bf16 %v1483_v9, %v1482_v8 }
 0x882   : > { %2075 = vmatmul.mubr.msk.bf16.vlgmr.msra.gmra.mxu0 %vm697_vm1, %v1484_v10 }
 0x942   : > { %v1545_v21 = vpop.f32.mrf.mxu0 }
 0x943   : > { %v1546_v22 = vadd.f32 %v1947_v20, %v1545_v21 }
 0x944   : > { %v2076_v23 = vpop.f32.mrf.mxu0 }
 0x945   : > { %v1552_v24 = vmul.f32 %v1546_v22, %v1546_v22 }
 0x946   : > { %v1548_v25 = vpop.f32.mrf.mxu0 }
 0x947   : > { %v1554_v26 = vmul.f32 %v1552_v24, %v1546_v22  ;;  %v1549_v27 = vadd.f32 %v1947_v20, %v1548_v25 }
 0x948   : > { %v2077_v28 = vpop.f32.mrf.mxu0 }
 0x949   : > { %v1556_v29 = vmul.f32 0.044715, %v1554_v26  ;;  %v1553_v30 = vmul.f32 %v1549_v27, %v1549_v27 }
 0x94b   : > { %v1558_v31 = vadd.f32 %v1556_v29, %v1546_v22  ;;  %v1555_v32 = vmul.f32 %v1553_v30, %v1549_v27 }
 0x94d   : > { %v1560_v17 = vmul.f32 0.7978846, %v1558_v31  ;;  %v1557_v33 = vmul.f32 0.044715, %v1555_v32 }
 0x94f   : > { %2264 = vtanh.f32 %v1560_v17  ;;  %v1559_v34 = vadd.f32 %v1557_v33, %v1549_v27 }
 0x951   : > { %v1561_v51 = vmul.f32 0.7978846, %v1559_v34 }
 0x953   : > { %2266 = vtanh.f32 %v1561_v51 }
 0x95c   : > { %v2265_v56 = vpop.eup %2264 }
 0x95d   : > { %v1564_v35 = vadd.f32 1.0, %v2265_v56 }
 0x95f   : > { %v1566_v37 = vmul.f32 0.5, %v1564_v35 }
 0x960   : > { %v2267_v52 = vpop.eup %2266 }
 0x961   : > { %v1565_v38 = vadd.f32 1.0, %v2267_v52  ;;  %v1568_v40 = vmul.f32 %v1566_v37, %v1546_v22 }
 0x963   : > { %v1567_v39 = vmul.f32 0.5, %v1565_v38 }
 0x965   : > { %v1569_v42 = vmul.f32 %v1567_v39, %v1549_v27 }
 0x967   : > { %v1570_v43 = vpack.c.bf16 %v1569_v42, %v1568_v40 }
 0x969   : > { %2095 = vmatmul.mubr.bf16.vlgmr.msra.gmra.mxu1 %v1570_v43 }
 0xa29   : > { %v1676_v2 = vpop.f32.mrf.mxu1 }
 0xa2a   : > { %v1677_v46 = vadd.f32 %v1951_v45, %v1676_v2 }
 0xa2b   : > { %v2096_v47 = vpop.f32.mrf.mxu1 }
 0xa2c   : > { %v1683_v48 = vadd.f32 %v1677_v46, %v2733_v36 }
 0xa2d   : > { %v1679_v49 = vpop.f32.mrf.mxu1 }
 0xa2e   : > { %1685 = vst.msk [vmem:[#allocation2] sm:$0xff] %vm697_vm1, %v1683_v48  ;;  %v1680_v50 = vadd.f32 %v1951_v45, %v1679_v49  ;;  %1690 = sbr.rel (%p1960_p1) target bundleno = 2612 (0xa34), region = 84 }
 0xa2f   : > { %v2097_v53 = vpop.f32.mrf.mxu1 }
 0xa30   : > { %v1684_v3 = vadd.f32 %v1680_v50, %v2738_v41 }
 0xa32   : > { %1686 = vst.msk [vmem:[#allocation2 + $0x8] sm:$0xff] %vm697_vm1, %v1684_v3 }
 0xa33   : > { %1691 = vst.msk [vmem:[%s2591_s12] sm:$0xff] %vm697_vm1, %v1683_v48  ;;  %1692 = vst.msk [vmem:[%s2591_s12 + $0x8] sm:$0xff] %vm697_vm1, %v1684_v3 }
 0xa34 PF: > { %s2930_s24 = sld [smem:[#allocation10_spill]]  ;;  %s1707_s22 = sshll.u32 %s2591_s12, 4  ;;  %s2801_s22 = int_to_ptr.vmem [resolvable:$true] %s1707_s22 }
 0xa35   : > { %s2931_s15 = sld [smem:[#allocation7_spill]]  ;;  %s2268_s27 = scalar_lea.vmem %s2801_s22, 256 }
 0xa36   : > { %s2933_s19 = sld [smem:[#allocation27_spill]]  ;;  %p2269_p2 = scmp.ne.s32.totalorder %s2801_s22, %s2268_s27 }
 0xa37   : > { %s2372_s14 = smov [#allocation3]  }
 0xa38   : > { %p2270_p4 = pnand %p2269_p2, %p2498_p3  ;;  %s2272_s20 = sshll.u32 %s2372_s14, 4  ;;  %s2273_s20 = int_to_ptr.vmem [resolvable:$false] %s2272_s20 }
 0xa39   : > { %s2274_s29 = scalar_lea.vmem %s2273_s20, 512  ;;  %p2275_p6 = scmp.lt.s32.totalorder %s2801_s22, %s2273_s20 }
 0xa3a   : > { %s1971_s4 = sshll.u32 %s2930_s24, 8  ;;  %p2271_p5 = pneg %p2270_p4 }
 0xa3b   : > { %s2935_s28 = sand.u32 1, %s2931_s15   ;;  %p2276_p7 = scmp.lt.s32.totalorder %s2274_s29, %s2268_s27 }
 0xa3c   : > { %s2934_s25 = smov %s2933_s19  ;;  %s2798_s26 = scalar_lea.hbm %s2933_s19, %s1971_s4 }
 0xa3d   : > { %s2805_s21 = scalar_lea.sflag [#allocation4], %s2935_s28  ;;  %p2277_p8 = por %p2276_p7, %p2275_p6 }
 0xa3f   : > { %p2278_p10 = pnand %p2277_p8, %p2271_p5 }
 0xa41   : > { %2281 = shalt.err (!%p2278_p10)
}
 0xa42   : > { %s2282_s12 = scalar_lea.hbm %s2798_s26, 256  ;;  %s2286_s1 = scalar_lea.hbm %s2934_s25, 512 }
 0xa43   : > { %p2283_p11 = scmp.ne.s32.totalorder %s2798_s26, %s2282_s12  ;;  %p2287_p0 = scmp.lt.s32.totalorder %s2798_s26, %s2934_s25 }
 0xa44   : > { %p2288_p1 = scmp.lt.s32.totalorder %s2286_s1, %s2282_s12 }
 0xa45   : > { %p2284_p12 = pnand %p2283_p11, %p2498_p3 }
 0xa46   : > { %p2289_p2 = por %p2288_p1, %p2287_p0 }
 0xa47   : > { %p2285_p13 = pneg %p2284_p12 }
 0xa49   : > { %p2290_p4 = pnand %p2289_p2, %p2285_p13 }
 0xa4b   : > { %2293 = shalt.err (!%p2290_p4)
}
 0xa4c   : > { %s2373_s13 = smov 128  }
 0xa4d   : > { %2098 = dma.vmem_to_hbm [thread:$0]  (%p2498_p3), %s2801_s22, 256, %s2798_s26, %s2805_s21, %s2373_s13, %s2373_s13, %s2369_s8  }
 0xa4e PF: > { %s2936_s24 = sld [smem:[#allocation13_spill]] }
 0xa4f   : > { %s2937_s15 = sld [smem:[#allocation6_spill]] }
 0xa54   : > { %p2104_p5 = scmp.ge.s32.totalorder %s2936_s24, 2 }
 0xa55   : > { %s1722_s18 = sand.u32 1, %s2937_s15  }
 0xa56   : > { %p2101_p6 = pnand %p2104_p5, %p2508_p9  ;;  %s1723_s23 = scalar_lea.sflag [#allocation4], %s1722_s18 }
 0xa58   : > { %p2102_p7 = pneg %p2101_p6 }
 0xa5a   : > { %2327 = dma.done.wait (%p2102_p7), %s1723_s23, 256  }
 0xa5b   : > { %2329 = vsyncadd (%p2102_p7), %s1723_s23, 4294967040  ;;  %s27_s20 = sadd.s32 1, %s2936_s24   ;;  %s2939_s29 = sld [smem:[#allocation7_spill]] }
 0xa5c   : > { %p24_p8 = scmp.ge.s32.totalorder %s27_s20, 6   ;;  %s2940_s30 = sld [smem:[#allocation8_spill]] }
 0xa5d   : > { %s2941_s15 = sld [smem:[#allocation18_spill]] }
 0xa5e   : > { %s2942_s16 = sld [smem:[#allocation11_spill]]  ;;  %26 = sbr.rel (!%p24_p8) target bundleno = 14 (0xe), region = 158 }
 0xa5f   : > { %s2943_s17 = sld [smem:[#allocation12_spill]] }
 0xa60   : > { %s2944_s18 = sld [smem:[#allocation14_spill]] }
 0xa61   : > { %s2945_s19 = sld [smem:[#allocation16_spill]] }
 0xa63   :  { %1728 = vsyncpa [#allocation4], 1 }
 0xa64   :  { %1730 = vsyncpa [#allocation4 + $0x1], 1 }

</bundles_post_ra>
